<compile_context>
chip_gen: v7x
topology: tpu7x:2x2x1
jax: 0.10.0
libtpu: 0.0.40
codegen_flags: <defaults>
</compile_context>

<pallas_src>
import jax
import jax.numpy as jnp
import numpy as np
from jax import lax
from jax.experimental import pallas as pl
from jax.experimental.pallas import tpu as pltpu

EPS = 1e-5  # nn.BatchNorm2d default


# ----------------------------- Pallas kernel --------------------------------
def _qarep_kernel(x_ref, w_ref, b_ref, o_ref, acc_ref):
    # x_ref:   (1, H+2, W+2, Cin)  zero-padded input, resident per batch element
    # w_ref:   (3, 3, Cin, Cout)   fused equivalent 3x3 kernel (HWIO, BN_out folded)
    # b_ref:   (1, Cout)           fused equivalent bias (BN_out folded), f32
    # o_ref:   (1, TH, W, Cout)    one row tile of the output
    # acc_ref: (TH*W, Cout) f32    VMEM accumulator scratch
    TH = o_ref.shape[1]
    W = o_ref.shape[2]
    Cout = o_ref.shape[3]
    Cin = x_ref.shape[3]

    r = pl.program_id(1)
    row0 = pl.multiple_of(r * TH, TH)

    # 3x3 conv over the whole row tile = 9 shifted (TH*W, Cin) x (Cin, Cout)
    # matmuls, f32-accumulated in VMEM scratch.
    first = True
    for dy in range(3):
        for dx in range(3):
            patch = x_ref[0, pl.ds(row0 + dy, TH), dx:dx + W, :]   # (TH, W, Cin)
            patch = patch.reshape(TH * W, Cin)
            contrib = jnp.dot(patch, w_ref[dy, dx],
                              preferred_element_type=jnp.float32)
            if first:
                acc_ref[...] = contrib
                first = False
            else:
                acc_ref[...] += contrib

    # Epilogue (f32): fused bias (all branches + BN_out), then SiLU.
    y = acc_ref[...] + b_ref[...]
    y = y * jax.nn.sigmoid(y)
    o_ref[0] = y.reshape(TH, W, Cout).astype(o_ref.dtype)


# ------------------------------- wrapper -------------------------------------
def _pick_row_tile(H, W):
    """Largest divisor of H that keeps the matmul M-dim (TH*W) around >=256."""
    target = max(1, 256 // max(W, 1))
    for th in range(min(H, target), 0, -1):
        if H % th == 0:
            return th
    return H


def qarepvgg_forward(x_nchw, w_hwio, bias, *, row_tile=None, compute_dtype=None):
    """Fused QARepVGGBlock forward.

    x_nchw:  (N, Cin, H, W)
    w_hwio:  (3, 3, Cin, Cout) equivalent kernel with BN_out folded in
    bias:    (Cout,)           equivalent bias with BN_out folded in
    compute_dtype: dtype for the matmul operands (e.g. jnp.bfloat16 on v6e/v7x);
                   accumulation and the epilogue stay f32.
    """
    N, Cin, H, W = x_nchw.shape
    Cout = w_hwio.shape[-1]
    out_dtype = x_nchw.dtype
    cdt = jnp.dtype(compute_dtype) if compute_dtype is not None else jnp.dtype(out_dtype)

    TH = row_tile if row_tile is not None else _pick_row_tile(H, W)
    if H % TH != 0:
        raise ValueError(f"row_tile={TH} must divide H={H}")
    n_rt = H // TH

    # NCHW -> NHWC (C lane-dense), cast to the matmul dtype, zero-pad the
    # 1-pixel conv halo.  transpose/convert/pad fuse into one XLA copy before
    # the pallas_call (no separate full-tensor pad pass).
    x = jnp.transpose(x_nchw, (0, 2, 3, 1)).astype(cdt)
    x_pad = jnp.pad(x, ((0, 0), (1, 1), (1, 1), (0, 0)))

    w = w_hwio.astype(cdt)                                   # (3,3,Cin,Cout)
    b2 = bias.reshape(1, Cout).astype(jnp.float32)           # (1,Cout), f32 epilogue

    # Explicit VMEM budget (re-derived per shape; double-buffered in/out blocks).
    in_bytes = (H + 2) * (W + 2) * Cin * jnp.dtype(cdt).itemsize
    out_bytes = TH * W * Cout * jnp.dtype(out_dtype).itemsize
    w_bytes = 9 * Cin * Cout * jnp.dtype(cdt).itemsize
    acc_bytes = TH * W * Cout * 4
    need = 2 * (in_bytes + out_bytes + w_bytes + Cout * 4) + acc_bytes + (2 << 20)
    vmem_limit = int(min(max(need, 16 << 20), 48 << 20))

    out = pl.pallas_call(
        _qarep_kernel,
        out_shape=jax.ShapeDtypeStruct((N, H, W, Cout), out_dtype),
        grid=(N, n_rt),
        in_specs=[
            # Full padded image per batch element; block index is constant in r,
            # so it stays resident across the row-tile axis (one DMA per n).
            pl.BlockSpec((1, H + 2, W + 2, Cin), lambda n, r: (n, 0, 0, 0)),
            pl.BlockSpec((3, 3, Cin, Cout), lambda n, r: (0, 0, 0, 0)),
            pl.BlockSpec((1, Cout), lambda n, r: (0, 0)),
        ],
        out_specs=pl.BlockSpec((1, TH, W, Cout), lambda n, r: (n, r, 0, 0)),
        scratch_shapes=[pltpu.VMEM((TH * W, Cout), jnp.float32)],
        compiler_params=pltpu.CompilerParams(
            dimension_semantics=("parallel", "parallel"),
            vmem_limit_bytes=vmem_limit),
    )(x_pad, w, b2)

    return jnp.transpose(out, (0, 3, 1, 2))                  # back to NCHW


# --------------------- parameter setup & branch fusion (glue) ----------------
def _fuse_bn(gamma, beta, mean, var, eps=EPS):
    std = jnp.sqrt(var + eps)
    scale = gamma / std
    shift = beta - mean * scale
    return scale, shift


def build_params(key, cin, cout):
    ks = jax.random.split(key, 10)

    def bn_params(k):
        k1, k2, k3, k4 = jax.random.split(k, 4)
        gamma = jax.random.uniform(k1, (cout,), minval=0.5, maxval=1.5)
        beta = 0.1 * jax.random.normal(k2, (cout,))
        mean = 0.1 * jax.random.normal(k3, (cout,))
        var = jax.random.uniform(k4, (cout,), minval=0.5, maxval=1.5)
        return (gamma, beta, mean, var)

    p = {
        "w_dense": 0.1 * jax.random.normal(ks[0], (cout, cin, 3, 3)),
        "w_1x1":   0.1 * jax.random.normal(ks[1], (cout, cin, 1, 1)),
        "w_3x1":   0.1 * jax.random.normal(ks[2], (cout, cin, 3, 1)),
        "w_1x3":   0.1 * jax.random.normal(ks[3], (cout, cin, 1, 3)),
        "bn_dense": bn_params(ks[4]),
        "bn_1x1":   bn_params(ks[5]),
        "bn_3x1":   bn_params(ks[6]),
        "bn_1x3":   bn_params(ks[7]),
        # Identity branch only exists when in == out channels and stride == 1
        # (mirrors rbr_identity=None otherwise).
        "bn_id":    bn_params(ks[8]) if cin == cout else None,
        "bn_out":   bn_params(ks[9]),
    }
    return p


def get_equivalent_kernel_bias(p, cin, cout):
    """Mirrors QARepVGGBlock.get_equivalent_kernel_bias (eval BN)."""
    def branch(kernel_oihw, bn):
        scale, shift = _fuse_bn(*bn)
        return kernel_oihw * scale[:, None, None, None], shift

    k3,  b3  = branch(p["w_dense"], p["bn_dense"])
    k1,  b1  = branch(p["w_1x1"],   p["bn_1x1"])
    k31, b31 = branch(p["w_3x1"],   p["bn_3x1"])
    k13, b13 = branch(p["w_1x3"],   p["bn_1x3"])

    k1  = jnp.pad(k1,  ((0, 0), (0, 0), (1, 1), (1, 1)))   # 1x1 -> center
    k31 = jnp.pad(k31, ((0, 0), (0, 0), (0, 0), (1, 1)))   # 3x1 -> center col
    k13 = jnp.pad(k13, ((0, 0), (1, 1), (0, 0)) if False else ((0, 0), (0, 0), (1, 1), (0, 0)))  # 1x3 -> center row

    if p["bn_id"] is not None:
        assert cin == cout, "identity branch requires in_channels == out_channels"
        sid, bid = _fuse_bn(*p["bn_id"])
        kid = jnp.zeros((cout, cin, 3, 3), jnp.float32)
        kid = kid.at[jnp.arange(cout), jnp.arange(cout) % cin, 1, 1].set(sid)
    else:
        kid, bid = 0.0, 0.0

    kernel_oihw = k3 + k1 + k31 + k13 + kid
    bias = b3 + b1 + b31 + b13 + bid
    return kernel_oihw, bias


def fold_bn_out(kernel_oihw, bias, bn_out, eps=EPS):
    """Exactly mirrors _fuse_extra_bn_tensor: fold BN_out into kernel/bias."""
    scale, shift = _fuse_bn(*bn_out, eps=eps)
    w = kernel_oihw * scale[:, None, None, None]
    b = bias * scale + shift
    return w, b


# --------------------- pure-JAX reference (per-branch, NCHW) -----------------
def reference_forward(x, p):
    def conv(x, w, pad):
        return lax.conv_general_dilated(
            x, w, window_strides=(1, 1), padding=pad,
            dimension_numbers=("NCHW", "OIHW", "NCHW"))

    def bn(y, params):
        g, b, m, v = params
        inv = 1.0 / jnp.sqrt(v + EPS)
        return (y - m[None, :, None, None]) * (g * inv)[None, :, None, None] \
               + b[None, :, None, None]

    out = bn(conv(x, p["w_dense"], ((1, 1), (1, 1))), p["bn_dense"])
    out = out + bn(conv(x, p["w_1x1"], ((0, 0), (0, 0))), p["bn_1x1"])
    out = out + bn(conv(x, p["w_3x1"], ((1, 1), (0, 0))), p["bn_3x1"])
    out = out + bn(conv(x, p["w_1x3"], ((0, 0), (1, 1))), p["bn_1x3"])
    if p["bn_id"] is not None:
        out = out + bn(x, p["bn_id"])
    out = bn(out, p["bn_out"])
    return out * jax.nn.sigmoid(out)   # SiLU


# ---------------------------------- main --------------------------------------
if __name__ == "__main__":
    key = jax.random.PRNGKey(0)
    kx, kp = jax.random.split(key)

    N, C, H, W = 2, 4, 16, 16        # in_channels == out_channels, stride = 1
    x = jax.random.normal(kx, (N, C, H, W), dtype=jnp.float32)

    params = build_params(kp, C, C)

    # Glue: fuse all branches + BN_out into one equivalent 3x3 kernel + bias.
    kernel_oihw, bias = get_equivalent_kernel_bias(params, C, C)
    w_fused, b_fused = fold_bn_out(kernel_oihw, bias, params["bn_out"])
    w_hwio = jnp.transpose(w_fused, (2, 3, 1, 0))            # OIHW -> HWIO

    ref = jax.block_until_ready(reference_forward(x, params))

    # f32 path; row_tile=8 exercises multiple row tiles per image.
    out_f32 = jax.block_until_ready(
        qarepvgg_forward(x, w_hwio, b_fused, row_tile=8))
    np.testing.assert_allclose(np.asarray(out_f32), np.asarray(ref),
                               rtol=1e-4, atol=1e-4)

    # bf16 matmul operands (v6e/v7x MXU path), f32 accumulate + f32 epilogue.
    out_bf16 = jax.block_until_ready(
        qarepvgg_forward(x, w_hwio, b_fused, compute_dtype=jnp.bfloat16))
    np.testing.assert_allclose(np.asarray(out_bf16), np.asarray(ref),
                               rtol=5e-2, atol=5e-2)

    print("KERNEL_OK")
</pallas_src>

<mosaic_0001>
module attributes {stable_mosaic.version = 11 : i64} {
  func.func @_qarep_kernel(%arg0: i32, %arg1: i32, %arg2: memref<1x18x18x4xf32, #tpu.memory_space<vmem>>, %arg3: memref<3x3x4x4xf32, #tpu.memory_space<vmem>>, %arg4: memref<1x4xf32, #tpu.memory_space<vmem>>, %arg5: memref<1x8x16x4xf32, #tpu.memory_space<vmem>>, %arg6: memref<128x4xf32, #tpu.memory_space<vmem>>) attributes {dimension_semantics = [#tpu.dimension_semantics<parallel>, #tpu.dimension_semantics<parallel>], iteration_bounds = array<i64: 2, 2>, scalar_prefetch = 0 : i64, scratch_operands = 1 : i64, tpu.core_type = #tpu.core_type<tc>, window_params = [{transform_indices = @transform_0, window_bounds = array<i64: 1, 18, 18, 4>}, {pipeline_mode = #tpu.pipeline_mode<synchronous>, transform_indices = @transform_1, window_bounds = array<i64: 3, 3, 4, 4>}, {pipeline_mode = #tpu.pipeline_mode<synchronous>, transform_indices = @transform_2, window_bounds = array<i64: 1, 4>}, {transform_indices = @transform_3, window_bounds = array<i64: 1, 8, 16, 4>}]} {
    %c8_i32 = arith.constant 8 : i32
    %0 = arith.muli %arg1, %c8_i32 : i32
    %1 = tpu.assume_multiple %0, 8 : i32
    %c0_i32 = arith.constant 0 : i32
    %2 = arith.addi %1, %c0_i32 : i32
    %c0 = arith.constant 0 : index
    %3 = arith.index_cast %2 : i32 to index
    %c0_0 = arith.constant 0 : index
    %c0_1 = arith.constant 0 : index
    %4 = vector.load %arg2[%c0, %3, %c0_0, %c0_1] : memref<1x18x18x4xf32, #tpu.memory_space<vmem>>, vector<1x8x16x4xf32>
    %5 = vector.shape_cast %4 : vector<1x8x16x4xf32> to vector<8x16x4xf32>
    %6 = vector.shape_cast %5 : vector<8x16x4xf32> to vector<128x4xf32>
    %c0_2 = arith.constant 0 : index
    %c0_3 = arith.constant 0 : index
    %c0_4 = arith.constant 0 : index
    %c0_5 = arith.constant 0 : index
    %7 = vector.load %arg3[%c0_2, %c0_3, %c0_4, %c0_5] : memref<3x3x4x4xf32, #tpu.memory_space<vmem>>, vector<1x1x4x4xf32>
    %8 = vector.shape_cast %7 : vector<1x1x4x4xf32> to vector<4x4xf32>
    %cst = arith.constant dense<0.000000e+00> : vector<128x4xf32>
    %9 = tpu.matmul %6, %8, %cst {dimension_numbers = #tpu.dot_dimension_numbers<[1], [0], [0], [1], [0, 0, 1, 1], [], []>} : vector<128x4xf32>, vector<4x4xf32>, vector<128x4xf32> -> vector<128x4xf32>
    %c0_6 = arith.constant 0 : index
    %c0_7 = arith.constant 0 : index
    %10 = vector.load %arg6[%c0_6, %c0_7] : memref<128x4xf32, #tpu.memory_space<vmem>>, vector<128x4xf32>
    tpu.vector_store %arg6[%c0_6, %c0_7], %9 {strides = array<i32>} : memref<128x4xf32, #tpu.memory_space<vmem>>, vector<128x4xf32>,
    %c0_i32_8 = arith.constant 0 : i32
    %11 = arith.addi %1, %c0_i32_8 : i32
    %c0_9 = arith.constant 0 : index
    %12 = arith.index_cast %11 : i32 to index
    %c1 = arith.constant 1 : index
    %c0_10 = arith.constant 0 : index
    %13 = vector.load %arg2[%c0_9, %12, %c1, %c0_10] : memref<1x18x18x4xf32, #tpu.memory_space<vmem>>, vector<1x8x16x4xf32>
    %14 = vector.shape_cast %13 : vector<1x8x16x4xf32> to vector<8x16x4xf32>
    %15 = vector.shape_cast %14 : vector<8x16x4xf32> to vector<128x4xf32>
    %c0_11 = arith.constant 0 : index
    %c1_12 = arith.constant 1 : index
    %c0_13 = arith.constant 0 : index
    %c0_14 = arith.constant 0 : index
    %16 = vector.load %arg3[%c0_11, %c1_12, %c0_13, %c0_14] : memref<3x3x4x4xf32, #tpu.memory_space<vmem>>, vector<1x1x4x4xf32>
    %17 = vector.shape_cast %16 : vector<1x1x4x4xf32> to vector<4x4xf32>
    %cst_15 = arith.constant dense<0.000000e+00> : vector<128x4xf32>
    %18 = tpu.matmul %15, %17, %cst_15 {dimension_numbers = #tpu.dot_dimension_numbers<[1], [0], [0], [1], [0, 0, 1, 1], [], []>} : vector<128x4xf32>, vector<4x4xf32>, vector<128x4xf32> -> vector<128x4xf32>
    %c0_16 = arith.constant 0 : index
    %c0_17 = arith.constant 0 : index
    %19 = vector.load %arg6[%c0_16, %c0_17] : memref<128x4xf32, #tpu.memory_space<vmem>>, vector<128x4xf32>
    %20 = arith.addf %19, %18 : vector<128x4xf32>
    %c0_18 = arith.constant 0 : index
    %c0_19 = arith.constant 0 : index
    %21 = vector.load %arg6[%c0_18, %c0_19] : memref<128x4xf32, #tpu.memory_space<vmem>>, vector<128x4xf32>
    tpu.vector_store %arg6[%c0_18, %c0_19], %20 {strides = array<i32>} : memref<128x4xf32, #tpu.memory_space<vmem>>, vector<128x4xf32>,
    %c0_i32_20 = arith.constant 0 : i32
    %22 = arith.addi %1, %c0_i32_20 : i32
    %c0_21 = arith.constant 0 : index
    %23 = arith.index_cast %22 : i32 to index
    %c2 = arith.constant 2 : index
    %c0_22 = arith.constant 0 : index
    %24 = vector.load %arg2[%c0_21, %23, %c2, %c0_22] : memref<1x18x18x4xf32, #tpu.memory_space<vmem>>, vector<1x8x16x4xf32>
    %25 = vector.shape_cast %24 : vector<1x8x16x4xf32> to vector<8x16x4xf32>
    %26 = vector.shape_cast %25 : vector<8x16x4xf32> to vector<128x4xf32>
    %c0_23 = arith.constant 0 : index
    %c2_24 = arith.constant 2 : index
    %c0_25 = arith.constant 0 : index
    %c0_26 = arith.constant 0 : index
    %27 = vector.load %arg3[%c0_23, %c2_24, %c0_25, %c0_26] : memref<3x3x4x4xf32, #tpu.memory_space<vmem>>, vector<1x1x4x4xf32>
    %28 = vector.shape_cast %27 : vector<1x1x4x4xf32> to vector<4x4xf32>
    %cst_27 = arith.constant dense<0.000000e+00> : vector<128x4xf32>
    %29 = tpu.matmul %26, %28, %cst_27 {dimension_numbers = #tpu.dot_dimension_numbers<[1], [0], [0], [1], [0, 0, 1, 1], [], []>} : vector<128x4xf32>, vector<4x4xf32>, vector<128x4xf32> -> vector<128x4xf32>
    %c0_28 = arith.constant 0 : index
    %c0_29 = arith.constant 0 : index
    %30 = vector.load %arg6[%c0_28, %c0_29] : memref<128x4xf32, #tpu.memory_space<vmem>>, vector<128x4xf32>
    %31 = arith.addf %30, %29 : vector<128x4xf32>
    %c0_30 = arith.constant 0 : index
    %c0_31 = arith.constant 0 : index
    %32 = vector.load %arg6[%c0_30, %c0_31] : memref<128x4xf32, #tpu.memory_space<vmem>>, vector<128x4xf32>
    tpu.vector_store %arg6[%c0_30, %c0_31], %31 {strides = array<i32>} : memref<128x4xf32, #tpu.memory_space<vmem>>, vector<128x4xf32>,
    %c1_i32 = arith.constant 1 : i32
    %33 = arith.addi %1, %c1_i32 : i32
    %c0_32 = arith.constant 0 : index
    %34 = arith.index_cast %33 : i32 to index
    %c0_33 = arith.constant 0 : index
    %c0_34 = arith.constant 0 : index
    %35 = vector.load %arg2[%c0_32, %34, %c0_33, %c0_34] : memref<1x18x18x4xf32, #tpu.memory_space<vmem>>, vector<1x8x16x4xf32>
    %36 = vector.shape_cast %35 : vector<1x8x16x4xf32> to vector<8x16x4xf32>
    %37 = vector.shape_cast %36 : vector<8x16x4xf32> to vector<128x4xf32>
    %c1_35 = arith.constant 1 : index
    %c0_36 = arith.constant 0 : index
    %c0_37 = arith.constant 0 : index
    %c0_38 = arith.constant 0 : index
    %38 = vector.load %arg3[%c1_35, %c0_36, %c0_37, %c0_38] : memref<3x3x4x4xf32, #tpu.memory_space<vmem>>, vector<1x1x4x4xf32>
    %39 = vector.shape_cast %38 : vector<1x1x4x4xf32> to vector<4x4xf32>
    %cst_39 = arith.constant dense<0.000000e+00> : vector<128x4xf32>
    %40 = tpu.matmul %37, %39, %cst_39 {dimension_numbers = #tpu.dot_dimension_numbers<[1], [0], [0], [1], [0, 0, 1, 1], [], []>} : vector<128x4xf32>, vector<4x4xf32>, vector<128x4xf32> -> vector<128x4xf32>
    %c0_40 = arith.constant 0 : index
    %c0_41 = arith.constant 0 : index
    %41 = vector.load %arg6[%c0_40, %c0_41] : memref<128x4xf32, #tpu.memory_space<vmem>>, vector<128x4xf32>
    %42 = arith.addf %41, %40 : vector<128x4xf32>
    %c0_42 = arith.constant 0 : index
    %c0_43 = arith.constant 0 : index
    %43 = vector.load %arg6[%c0_42, %c0_43] : memref<128x4xf32, #tpu.memory_space<vmem>>, vector<128x4xf32>
    tpu.vector_store %arg6[%c0_42, %c0_43], %42 {strides = array<i32>} : memref<128x4xf32, #tpu.memory_space<vmem>>, vector<128x4xf32>,
    %c1_i32_44 = arith.constant 1 : i32
    %44 = arith.addi %1, %c1_i32_44 : i32
    %c0_45 = arith.constant 0 : index
    %45 = arith.index_cast %44 : i32 to index
    %c1_46 = arith.constant 1 : index
    %c0_47 = arith.constant 0 : index
    %46 = vector.load %arg2[%c0_45, %45, %c1_46, %c0_47] : memref<1x18x18x4xf32, #tpu.memory_space<vmem>>, vector<1x8x16x4xf32>
    %47 = vector.shape_cast %46 : vector<1x8x16x4xf32> to vector<8x16x4xf32>
    %48 = vector.shape_cast %47 : vector<8x16x4xf32> to vector<128x4xf32>
    %c1_48 = arith.constant 1 : index
    %c1_49 = arith.constant 1 : index
    %c0_50 = arith.constant 0 : index
    %c0_51 = arith.constant 0 : index
    %49 = vector.load %arg3[%c1_48, %c1_49, %c0_50, %c0_51] : memref<3x3x4x4xf32, #tpu.memory_space<vmem>>, vector<1x1x4x4xf32>
    %50 = vector.shape_cast %49 : vector<1x1x4x4xf32> to vector<4x4xf32>
    %cst_52 = arith.constant dense<0.000000e+00> : vector<128x4xf32>
    %51 = tpu.matmul %48, %50, %cst_52 {dimension_numbers = #tpu.dot_dimension_numbers<[1], [0], [0], [1], [0, 0, 1, 1], [], []>} : vector<128x4xf32>, vector<4x4xf32>, vector<128x4xf32> -> vector<128x4xf32>
    %c0_53 = arith.constant 0 : index
    %c0_54 = arith.constant 0 : index
    %52 = vector.load %arg6[%c0_53, %c0_54] : memref<128x4xf32, #tpu.memory_space<vmem>>, vector<128x4xf32>
    %53 = arith.addf %52, %51 : vector<128x4xf32>
    %c0_55 = arith.constant 0 : index
    %c0_56 = arith.constant 0 : index
    %54 = vector.load %arg6[%c0_55, %c0_56] : memref<128x4xf32, #tpu.memory_space<vmem>>, vector<128x4xf32>
    tpu.vector_store %arg6[%c0_55, %c0_56], %53 {strides = array<i32>} : memref<128x4xf32, #tpu.memory_space<vmem>>, vector<128x4xf32>,
    %c1_i32_57 = arith.constant 1 : i32
    %55 = arith.addi %1, %c1_i32_57 : i32
    %c0_58 = arith.constant 0 : index
    %56 = arith.index_cast %55 : i32 to index
    %c2_59 = arith.constant 2 : index
    %c0_60 = arith.constant 0 : index
    %57 = vector.load %arg2[%c0_58, %56, %c2_59, %c0_60] : memref<1x18x18x4xf32, #tpu.memory_space<vmem>>, vector<1x8x16x4xf32>
    %58 = vector.shape_cast %57 : vector<1x8x16x4xf32> to vector<8x16x4xf32>
    %59 = vector.shape_cast %58 : vector<8x16x4xf32> to vector<128x4xf32>
    %c1_61 = arith.constant 1 : index
    %c2_62 = arith.constant 2 : index
    %c0_63 = arith.constant 0 : index
    %c0_64 = arith.constant 0 : index
    %60 = vector.load %arg3[%c1_61, %c2_62, %c0_63, %c0_64] : memref<3x3x4x4xf32, #tpu.memory_space<vmem>>, vector<1x1x4x4xf32>
    %61 = vector.shape_cast %60 : vector<1x1x4x4xf32> to vector<4x4xf32>
    %cst_65 = arith.constant dense<0.000000e+00> : vector<128x4xf32>
    %62 = tpu.matmul %59, %61, %cst_65 {dimension_numbers = #tpu.dot_dimension_numbers<[1], [0], [0], [1], [0, 0, 1, 1], [], []>} : vector<128x4xf32>, vector<4x4xf32>, vector<128x4xf32> -> vector<128x4xf32>
    %c0_66 = arith.constant 0 : index
    %c0_67 = arith.constant 0 : index
    %63 = vector.load %arg6[%c0_66, %c0_67] : memref<128x4xf32, #tpu.memory_space<vmem>>, vector<128x4xf32>
    %64 = arith.addf %63, %62 : vector<128x4xf32>
    %c0_68 = arith.constant 0 : index
    %c0_69 = arith.constant 0 : index
    %65 = vector.load %arg6[%c0_68, %c0_69] : memref<128x4xf32, #tpu.memory_space<vmem>>, vector<128x4xf32>
    tpu.vector_store %arg6[%c0_68, %c0_69], %64 {strides = array<i32>} : memref<128x4xf32, #tpu.memory_space<vmem>>, vector<128x4xf32>,
    %c2_i32 = arith.constant 2 : i32
    %66 = arith.addi %1, %c2_i32 : i32
    %c0_70 = arith.constant 0 : index
    %67 = arith.index_cast %66 : i32 to index
    %c0_71 = arith.constant 0 : index
    %c0_72 = arith.constant 0 : index
    %68 = vector.load %arg2[%c0_70, %67, %c0_71, %c0_72] : memref<1x18x18x4xf32, #tpu.memory_space<vmem>>, vector<1x8x16x4xf32>
    %69 = vector.shape_cast %68 : vector<1x8x16x4xf32> to vector<8x16x4xf32>
    %70 = vector.shape_cast %69 : vector<8x16x4xf32> to vector<128x4xf32>
    %c2_73 = arith.constant 2 : index
    %c0_74 = arith.constant 0 : index
    %c0_75 = arith.constant 0 : index
    %c0_76 = arith.constant 0 : index
    %71 = vector.load %arg3[%c2_73, %c0_74, %c0_75, %c0_76] : memref<3x3x4x4xf32, #tpu.memory_space<vmem>>, vector<1x1x4x4xf32>
    %72 = vector.shape_cast %71 : vector<1x1x4x4xf32> to vector<4x4xf32>
    %cst_77 = arith.constant dense<0.000000e+00> : vector<128x4xf32>
    %73 = tpu.matmul %70, %72, %cst_77 {dimension_numbers = #tpu.dot_dimension_numbers<[1], [0], [0], [1], [0, 0, 1, 1], [], []>} : vector<128x4xf32>, vector<4x4xf32>, vector<128x4xf32> -> vector<128x4xf32>
    %c0_78 = arith.constant 0 : index
    %c0_79 = arith.constant 0 : index
    %74 = vector.load %arg6[%c0_78, %c0_79] : memref<128x4xf32, #tpu.memory_space<vmem>>, vector<128x4xf32>
    %75 = arith.addf %74, %73 : vector<128x4xf32>
    %c0_80 = arith.constant 0 : index
    %c0_81 = arith.constant 0 : index
    %76 = vector.load %arg6[%c0_80, %c0_81] : memref<128x4xf32, #tpu.memory_space<vmem>>, vector<128x4xf32>
    tpu.vector_store %arg6[%c0_80, %c0_81], %75 {strides = array<i32>} : memref<128x4xf32, #tpu.memory_space<vmem>>, vector<128x4xf32>,
    %c2_i32_82 = arith.constant 2 : i32
    %77 = arith.addi %1, %c2_i32_82 : i32
    %c0_83 = arith.constant 0 : index
    %78 = arith.index_cast %77 : i32 to index
    %c1_84 = arith.constant 1 : index
    %c0_85 = arith.constant 0 : index
    %79 = vector.load %arg2[%c0_83, %78, %c1_84, %c0_85] : memref<1x18x18x4xf32, #tpu.memory_space<vmem>>, vector<1x8x16x4xf32>
    %80 = vector.shape_cast %79 : vector<1x8x16x4xf32> to vector<8x16x4xf32>
    %81 = vector.shape_cast %80 : vector<8x16x4xf32> to vector<128x4xf32>
    %c2_86 = arith.constant 2 : index
    %c1_87 = arith.constant 1 : index
    %c0_88 = arith.constant 0 : index
    %c0_89 = arith.constant 0 : index
    %82 = vector.load %arg3[%c2_86, %c1_87, %c0_88, %c0_89] : memref<3x3x4x4xf32, #tpu.memory_space<vmem>>, vector<1x1x4x4xf32>
    %83 = vector.shape_cast %82 : vector<1x1x4x4xf32> to vector<4x4xf32>
    %cst_90 = arith.constant dense<0.000000e+00> : vector<128x4xf32>
    %84 = tpu.matmul %81, %83, %cst_90 {dimension_numbers = #tpu.dot_dimension_numbers<[1], [0], [0], [1], [0, 0, 1, 1], [], []>} : vector<128x4xf32>, vector<4x4xf32>, vector<128x4xf32> -> vector<128x4xf32>
    %c0_91 = arith.constant 0 : index
    %c0_92 = arith.constant 0 : index
    %85 = vector.load %arg6[%c0_91, %c0_92] : memref<128x4xf32, #tpu.memory_space<vmem>>, vector<128x4xf32>
    %86 = arith.addf %85, %84 : vector<128x4xf32>
    %c0_93 = arith.constant 0 : index
    %c0_94 = arith.constant 0 : index
    %87 = vector.load %arg6[%c0_93, %c0_94] : memref<128x4xf32, #tpu.memory_space<vmem>>, vector<128x4xf32>
    tpu.vector_store %arg6[%c0_93, %c0_94], %86 {strides = array<i32>} : memref<128x4xf32, #tpu.memory_space<vmem>>, vector<128x4xf32>,
    %c2_i32_95 = arith.constant 2 : i32
    %88 = arith.addi %1, %c2_i32_95 : i32
    %c0_96 = arith.constant 0 : index
    %89 = arith.index_cast %88 : i32 to index
    %c2_97 = arith.constant 2 : index
    %c0_98 = arith.constant 0 : index
    %90 = vector.load %arg2[%c0_96, %89, %c2_97, %c0_98] : memref<1x18x18x4xf32, #tpu.memory_space<vmem>>, vector<1x8x16x4xf32>
    %91 = vector.shape_cast %90 : vector<1x8x16x4xf32> to vector<8x16x4xf32>
    %92 = vector.shape_cast %91 : vector<8x16x4xf32> to vector<128x4xf32>
    %c2_99 = arith.constant 2 : index
    %c2_100 = arith.constant 2 : index
    %c0_101 = arith.constant 0 : index
    %c0_102 = arith.constant 0 : index
    %93 = vector.load %arg3[%c2_99, %c2_100, %c0_101, %c0_102] : memref<3x3x4x4xf32, #tpu.memory_space<vmem>>, vector<1x1x4x4xf32>
    %94 = vector.shape_cast %93 : vector<1x1x4x4xf32> to vector<4x4xf32>
    %cst_103 = arith.constant dense<0.000000e+00> : vector<128x4xf32>
    %95 = tpu.matmul %92, %94, %cst_103 {dimension_numbers = #tpu.dot_dimension_numbers<[1], [0], [0], [1], [0, 0, 1, 1], [], []>} : vector<128x4xf32>, vector<4x4xf32>, vector<128x4xf32> -> vector<128x4xf32>
    %c0_104 = arith.constant 0 : index
    %c0_105 = arith.constant 0 : index
    %96 = vector.load %arg6[%c0_104, %c0_105] : memref<128x4xf32, #tpu.memory_space<vmem>>, vector<128x4xf32>
    %97 = arith.addf %96, %95 : vector<128x4xf32>
    %c0_106 = arith.constant 0 : index
    %c0_107 = arith.constant 0 : index
    %98 = vector.load %arg6[%c0_106, %c0_107] : memref<128x4xf32, #tpu.memory_space<vmem>>, vector<128x4xf32>
    tpu.vector_store %arg6[%c0_106, %c0_107], %97 {strides = array<i32>} : memref<128x4xf32, #tpu.memory_space<vmem>>, vector<128x4xf32>,
    %c0_108 = arith.constant 0 : index
    %c0_109 = arith.constant 0 : index
    %99 = vector.load %arg6[%c0_108, %c0_109] : memref<128x4xf32, #tpu.memory_space<vmem>>, vector<128x4xf32>
    %c0_110 = arith.constant 0 : index
    %c0_111 = arith.constant 0 : index
    %100 = vector.load %arg4[%c0_110, %c0_111] : memref<1x4xf32, #tpu.memory_space<vmem>>, vector<1x4xf32>
    %101 = vector.broadcast %100 : vector<1x4xf32> to vector<128x4xf32>
    %102 = arith.addf %99, %101 : vector<128x4xf32>
    %103 = arith.negf %102 : vector<128x4xf32>
    %104 = math.exp %103 : vector<128x4xf32>
    %cst_112 = arith.constant 1.000000e+00 : f32
    %105 = vector.broadcast %cst_112 : f32 to vector<128x4xf32>
    %106 = arith.addf %105, %104 : vector<128x4xf32>
    %107 = arith.divf %105, %106 : vector<128x4xf32>
    %108 = arith.mulf %102, %107 : vector<128x4xf32>
    %109 = vector.shape_cast %108 : vector<128x4xf32> to vector<8x16x4xf32>
    %c0_113 = arith.constant 0 : index
    %c0_114 = arith.constant 0 : index
    %c0_115 = arith.constant 0 : index
    %c0_116 = arith.constant 0 : index
    %110 = vector.load %arg5[%c0_113, %c0_114, %c0_115, %c0_116] : memref<1x8x16x4xf32, #tpu.memory_space<vmem>>, vector<1x8x16x4xf32>
    %111 = vector.shape_cast %110 : vector<1x8x16x4xf32> to vector<8x16x4xf32>
    %112 = vector.shape_cast %109 : vector<8x16x4xf32> to vector<1x8x16x4xf32>
    tpu.vector_store %arg5[%c0_113, %c0_114, %c0_115, %c0_116], %112 {strides = array<i32>} : memref<1x8x16x4xf32, #tpu.memory_space<vmem>>, vector<1x8x16x4xf32>,
    return
  }
  func.func @transform_0(%arg0: i32, %arg1: i32) -> (i32, i32, i32, i32) {
    %c0_i32 = arith.constant 0 : i32
    %c0_i32_0 = arith.constant 0 : i32
    %c0_i32_1 = arith.constant 0 : i32
    %c0_i32_2 = arith.constant 0 : i32
    return %arg0, %c0_i32, %c0_i32_0, %c0_i32_1 : i32, i32, i32, i32
  }
  func.func @transform_1(%arg0: i32, %arg1: i32) -> (i32, i32, i32, i32) {
    %c0_i32 = arith.constant 0 : i32
    %c0_i32_0 = arith.constant 0 : i32
    %c0_i32_1 = arith.constant 0 : i32
    %c0_i32_2 = arith.constant 0 : i32
    %c0_i32_3 = arith.constant 0 : i32
    return %c0_i32, %c0_i32_0, %c0_i32_1, %c0_i32_2 : i32, i32, i32, i32
  }
  func.func @transform_2(%arg0: i32, %arg1: i32) -> (i32, i32) {
    %c0_i32 = arith.constant 0 : i32
    %c0_i32_0 = arith.constant 0 : i32
    %c0_i32_1 = arith.constant 0 : i32
    return %c0_i32, %c0_i32_0 : i32, i32
  }
  func.func @transform_3(%arg0: i32, %arg1: i32) -> (i32, i32, i32, i32) {
    %c0_i32 = arith.constant 0 : i32
    %c0_i32_0 = arith.constant 0 : i32
    %c0_i32_1 = arith.constant 0 : i32
    return %arg0, %arg1, %c0_i32, %c0_i32_0 : i32, i32, i32, i32
  }
}

</mosaic_0001>

<bundles_post_ra>
// kernel: tpu_custom_call.1
= control target key start
LH: loop header
LB: loop body
LE: loop exit
PB: predicated region body
PF: predicated region fallthrough
CT: control target
= control target key end

     0   :  { %s3645_s12 = smov 0   ;;  %s3647_s13 = smov 0   ;;  %s4453_s0 = inlined_call_operand.vmem [shape: f32[2,18,18,4], index: 0, kind: input, shape index: {}]   ;;  %s4454_s1 = inlined_call_operand.vmem [shape: f32[3,3,4,4], index: 1, kind: input, shape index: {}]   ;;  %s4455_s2 = inlined_call_operand.vmem [shape: f32[1,4], index: 2, kind: input, shape index: {}]   ;;  %s4456_s3 = inlined_call_operand.vmem [shape: f32[2,16,16,4], index: 3, kind: output, shape index: {}]  }
   0x1   :  { %s3649_s14 = smov 0   ;;  %s3651_s15 = smov 0  }
   0x2   :  { %s3653_s16 = smov 0  }
   0x3 LB: > { %s22_s17 = sadd.s32 1, %s3615_s14  ;;  %s25_s18 = sadd.s32 1, %s3619_s15  ;;  %s3623_s16 = sphi %s3653_s16, %s13_s16   ;;  %s3619_s15 = sphi %s3651_s15, %s4461_s15   ;;  %s3615_s14 = sphi %s3649_s14, %s4460_s14   ;;  %s3611_s13 = sphi %s3647_s13, %s4459_s13   ;;  %s3607_s12 = sphi %s3645_s12, %s4458_s12  }
   0x4   : > { %p23_p0 = scmp.ge.s32.totalorder %s22_s17, 2  ;;  %p2803_p1 = scmp.ge.s32.totalorder %s3623_s16, 1 }
   0x5   : > { %p151_p2 = scmp.lt.s32.totalorder %s3623_s16, 5 }
   0x6   : > { %s4463_s17 = smov (%p23_p0, %s22_s17), 0  ;;  %s4465_s18 = smov (!%p23_p0, %s25_s18), %s3619_s15 }
   0x7   : > { %p152_p3 = pnand %p2803_p1, %p151_p2  ;;  %p27_p4 = scmp.ge.s32.totalorder %s4465_s18, 2 }
   0x8   : > { %v215_v0 = vld [vmem:[%s4454_s1] sm:$0xf] (!%p152_p3)  ;;  %vm265_vm0 = vcmask (!%p152_p3), 1043456   ;;  %p180_p5 = scmp.lt.s32.totalorder (!%p152_p3), %s3611_s13, 1  ;;  %v2828_v1 = vld [vmem:[%s4454_s1 + $0x4] sm:$0xf] (!%p152_p3) }
   0x9   : > { %s4467_s18 = smov (%p27_p4, %s4465_s18), 0  ;;  %155 = sbr.rel (%p152_p3) target bundleno = 429 (0x1ad), region = 32 }
   0xa   : > { %3478 = vmatprep.subr.msk.mxu1 (!%p152_p3), %vm265_vm0, %v215_v0  ;;  %3244 = vmatprep.subr.msk.mxu0 (!%p152_p3), %vm265_vm0, %v215_v0  ;;  %v2846_v2 = vld [vmem:[%s4454_s1 + $0x8] sm:$0xf] (!%p152_p3)  ;;  %s2810_s25 = smul.u32 (!%p152_p3), 192, %s3607_s12  ;;  %vm216_vm1 = vcmask (!%p152_p3), 31744   ;;  %v2882_v7 = vld [vmem:[%s4454_s1 + $0xc] sm:$0xf] (!%p152_p3) }
   0xb   : > { %3479 = vmatpush3.msk.msra.mxu1 (!%p152_p3), %vm265_vm0, %v215_v0  ;;  %3245 = vmatpush3.msk.msra.mxu0 (!%p152_p3), %vm265_vm0, %v215_v0  ;;  %v2916_v11 = vld [vmem:[%s4454_s1 + $0x10] sm:$0xf] (!%p152_p3)  ;;  %v3797_v26 = vld [vmem:[%s4454_s1 + $0x14] sm:$0xf] (!%p152_p3)  ;;  %v3812_v29 = vld [vmem:[%s4454_s1 + $0x18] sm:$0xf] (!%p152_p3) }
   0xc   : > { %3270 = vmatprep.subr.msk.mxu1 (!%p152_p3), %vm265_vm0, %v2828_v1  ;;  %3296 = vmatprep.subr.msk.mxu0 (!%p152_p3), %vm265_vm0, %v2846_v2  ;;  %v3020_v55 = vld [vmem:[%s4454_s1 + $0x1c] sm:$0xf] (!%p152_p3)  ;;  %v3054_v56 = vld [vmem:[%s4454_s1 + $0x20] sm:$0xf] (!%p152_p3) }
  0x10   : > { %s4469_s13 = smov (!%p180_p5, %s3611_s13), 1 }
  0x11   : > { %s3480_s26 = smul.u32 432, %s4469_s13  ;;  %s2807_s27 = sshll.u32 %s4469_s13, 5 }
  0x13   : > { %s184_s29 = scalar_lea.vmem %s4453_s0, %s3480_s26 }
  0x14   : > { %s3699_s30 = scalar_lea.vmem %s184_s29, %s2810_s25  ;;  %s2805_s25 = sshll.u32 %s3607_s12, 3 }
  0x15   : > { %v3702_v3 = vld [vmem:[%s3699_s30 + $0x60] sm:$0xff]  ;;  %v3705_v4 = vld [vmem:[%s3699_s30 + $0x68] sm:$0xff]  ;;  %v3708_v5 = vld [vmem:[%s3699_s30 + $0x78] sm:$0xff]  ;;  %p4323_p6 = scmp.lt.s32.totalorder %s2805_s25, 15 }
  0x16   : > { %3258 = vmatprep.mubr.msk.f32.mxu1 %vm216_vm1, %v3702_v3  ;;  %v199_v6 = vld [vmem:[%s3699_s30] sm:$0xff]  ;;  %v200_v8 = vld [vmem:[%s3699_s30 + $0x8] sm:$0xff]  ;;  %v3721_v9 = vld [vmem:[%s3699_s30 + $0x18] sm:$0xff] }
  0x17   : > { %3259 = vmatmul.mubr.msk.f32.vlgmr.msra.gmra.mrb[0].mxu1 %vm216_vm1, %v3705_v4  ;;  %3246 = vmatprep.mubr.msk.f32.mxu0 %vm216_vm1, %v199_v6  ;;  %v3727_v10 = vld [vmem:[%s3699_s30 + $0x80] sm:$0xff]  ;;  %v3733_v12 = vld [vmem:[%s3699_s30 + $0x90] sm:$0xff]  ;;  %v3752_v15 = vld [vmem:[%s3699_s30 + $0x98] sm:$0xff]  ;;  %s4471_s25 = smov (!%p4323_p6, %s2805_s25), 15 }
  0x18   : > { %3271 = vmatpush3.msk.msra.mxu1 %vm265_vm0, %v2828_v1  ;;  %3261 = vmatprep.mubr.msk.f32.mxu1 %vm216_vm1, %v3708_v5  ;;  %v3741_v13 = vld [vmem:[%s3699_s30 + $0x20] sm:$0xff]  ;;  %v3746_v14 = vld [vmem:[%s3699_s30 + $0x30] sm:$0xff]  ;;  %v3755_v16 = vld [vmem:[%s3699_s30 + $0xa8] sm:$0xff]  ;;  %s2806_s12 = sshll.u32 %s4471_s25, 1 }
  0x19   : > { %3247 = vmatmul.mubr.msk.f32.vlgmr.msra.gmra.mrb[0].mxu0 %vm216_vm1, %v200_v8  ;;  %3322 = vmatprep.subr.msk.mxu1 %vm265_vm0, %v2882_v7  ;;  %v3762_v17 = vld [vmem:[%s3699_s30 + $0x38] sm:$0xff]  ;;  %v3767_v18 = vld [vmem:[%s3699_s30 + $0x48] sm:$0xff]  ;;  %v3772_v19 = vld [vmem:[%s3699_s30 + $0xb0] sm:$0xff]  ;;  %s192_s13 = sadd.s32 %s2807_s27, %s2806_s12 }
  0x1a   : > { %3297 = vmatpush3.msk.msra.mxu0 %vm265_vm0, %v2846_v2  ;;  %3249 = vmatprep.mubr.msk.f32.mxu0 %vm216_vm1, %v3721_v9  ;;  %v430_v20 = vld [vmem:[%s3699_s30 + $0x1] sm:$0xff]  ;;  %v3780_v21 = vld [vmem:[%s3699_s30 + $0x50] sm:$0xff]  ;;  %v3788_v24 = vld [vmem:[%s3699_s30 + $0x19] sm:$0xff]  ;;  %s2808_s28 = sshll.u32 %s192_s13, 3 }
  0x1b   : > { %3262 = vmatmul.mubr.msk.f32.gmra.mrb[2].mxu1 %vm216_vm1, %v3727_v10  ;;  %3348 = vmatprep.subr.msk.mxu0 %vm265_vm0, %v2916_v11  ;;  %v692_v22 = vld [vmem:[%s3699_s30 + $0x2] sm:$0xff]  ;;  %v693_v25 = vld [vmem:[%s3699_s30 + $0xa] sm:$0xff]  ;;  %v3801_v27 = vld [vmem:[%s3699_s30 + $0x1a] sm:$0xff]  ;;  %s4379_s4 = scalar_lea.vmem %s4456_s3, %s2808_s28 }
  0x1c   : > { %3264 = vmatprep.mubr.msk.f32.mxu1 %vm216_vm1, %v3733_v12  ;;  %v431_v23 = vld [vmem:[%s3699_s30 + $0x9] sm:$0xff]  ;;  %v3807_v28 = vld [vmem:[%s3699_s30 + $0x21] sm:$0xff]  ;;  %v3815_v30 = vld [vmem:[%s3699_s30 + $0x31] sm:$0xff] }
  0x1d   : > { %3250 = vmatmul.mubr.msk.f32.gmra.mrb[2].mxu0 %vm216_vm1, %v3741_v13  ;;  %v3824_v31 = vld [vmem:[%s3699_s30 + $0x22] sm:$0xff]  ;;  %v3829_v32 = vld [vmem:[%s3699_s30 + $0x32] sm:$0xff]  ;;  %v3846_v35 = vld [vmem:[%s3699_s30 + $0x3a] sm:$0xff] }
  0x1e   : > { %3252 = vmatprep.mubr.msk.f32.mxu0 %vm216_vm1, %v3746_v14  ;;  %v3836_v33 = vld [vmem:[%s3699_s30 + $0x39] sm:$0xff]  ;;  %v3839_v34 = vld [vmem:[%s3699_s30 + $0x49] sm:$0xff]  ;;  %v3856_v37 = vld [vmem:[%s3699_s30 + $0x51] sm:$0xff] }
  0x1f   : > { %3265 = vmatmul.mubr.msk.f32.gmra.mrb[4].mxu1 %vm216_vm1, %v3752_v15  ;;  %v3851_v36 = vld [vmem:[%s3699_s30 + $0x4a] sm:$0xff]  ;;  %v3859_v38 = vld [vmem:[%s3699_s30 + $0x61] sm:$0xff]  ;;  %v3866_v39 = vld [vmem:[%s3699_s30 + $0x52] sm:$0xff] }
  0x20   : > { %3267 = vmatprep.mubr.msk.f32.mxu1 %vm216_vm1, %v3755_v16  ;;  %v3871_v40 = vld [vmem:[%s3699_s30 + $0x62] sm:$0xff]  ;;  %v3879_v42 = vld [vmem:[%s3699_s30 + $0x79] sm:$0xff]  ;;  %v3886_v43 = vld [vmem:[%s3699_s30 + $0x6a] sm:$0xff] }
  0x21   : > { %3253 = vmatmul.mubr.msk.f32.gmra.mrb[4].mxu0 %vm216_vm1, %v3762_v17  ;;  %v3876_v41 = vld [vmem:[%s3699_s30 + $0x69] sm:$0xff]  ;;  %v3891_v44 = vld [vmem:[%s3699_s30 + $0x7a] sm:$0xff]  ;;  %v3899_v46 = vld [vmem:[%s3699_s30 + $0x91] sm:$0xff] }
  0x22   : > { %3255 = vmatprep.mubr.msk.f32.mxu0 %vm216_vm1, %v3767_v18  ;;  %v3896_v45 = vld [vmem:[%s3699_s30 + $0x81] sm:$0xff]  ;;  %v3911_v48 = vld [vmem:[%s3699_s30 + $0x92] sm:$0xff]  ;;  %v3919_v50 = vld [vmem:[%s3699_s30 + $0xa9] sm:$0xff] }
  0x23   : > { %3268 = vmatmul.mubr.msk.f32.gmra.mrb[6].mxu1 %vm216_vm1, %v3772_v19  ;;  %v3906_v47 = vld [vmem:[%s3699_s30 + $0x82] sm:$0xff]  ;;  %v3916_v49 = vld [vmem:[%s3699_s30 + $0x99] sm:$0xff]  ;;  %v3931_v52 = vld [vmem:[%s3699_s30 + $0xaa] sm:$0xff] }
  0x24   : > { %3272 = vmatprep.mubr.msk.f32.mxu1 %vm216_vm1, %v430_v20  ;;  %v3926_v51 = vld [vmem:[%s3699_s30 + $0x9a] sm:$0xff]  ;;  %v3936_v53 = vld [vmem:[%s3699_s30 + $0xb1] sm:$0xff]  ;;  %v2881_v59 = vld [vmem:[%s3699_s30 + $0xc8] sm:$0xff] }
  0x25   : > { %3256 = vmatmul.mubr.msk.f32.gmra.mrb[6].mxu0 %vm216_vm1, %v3780_v21  ;;  %v3943_v54 = vld [vmem:[%s3699_s30 + $0xb2] sm:$0xff]  ;;  %v2880_v57 = vld [vmem:[%s3699_s30 + $0xc0] sm:$0xff]  ;;  %v4026_v60 = vld [vmem:[%s3699_s30 + $0xc9] sm:$0xff] }
  0x26   : > { %3298 = vmatprep.mubr.msk.f32.mxu0 %vm216_vm1, %v692_v22  ;;  %v4017_v58 = vld [vmem:[%s3699_s30 + $0xc1] sm:$0xff]  ;;  %v2984_v62 = vld [vmem:[%s3699_s30 + $0xd8] sm:$0xff]  ;;  %v2949_v63 = vld [vmem:[%s3699_s30 + $0xca] sm:$0xff] }
  0x27   : > { %3273 = vmatmul.mubr.msk.f32.vlgmr.msra.gmra.mrb[8].mxu1 %vm216_vm1, %v431_v23  ;;  %v2948_v61 = vld [vmem:[%s3699_s30 + $0xc2] sm:$0xff]  ;;  %v3018_v1 = vld [vmem:[%s3699_s30 + $0xd9] sm:$0xff] }
  0x28   : > { %3323 = vmatpush3.msk.msra.mxu1 %vm265_vm0, %v2882_v7  ;;  %3275 = vmatprep.mubr.msk.f32.mxu1 %vm216_vm1, %v3788_v24  ;;  %v2985_v0 = vld [vmem:[%s3699_s30 + $0xe0] sm:$0xff] }
  0x29   : > { %3299 = vmatmul.mubr.msk.f32.vlgmr.msra.gmra.mrb[8].mxu0 %vm216_vm1, %v693_v25  ;;  %3374 = vmatprep.subr.msk.mxu1 %vm265_vm0, %v3797_v26  ;;  %v3052_v2 = vld [vmem:[%s3699_s30 + $0xda] sm:$0xff] }
  0x2a   : > { %3349 = vmatpush3.msk.msra.mxu0 %vm265_vm0, %v2916_v11  ;;  %3301 = vmatprep.mubr.msk.f32.mxu0 %vm216_vm1, %v3801_v27 }
  0x2b   : > { %3276 = vmatmul.mubr.msk.f32.gmra.mrb[10].mxu1 %vm216_vm1, %v3807_v28  ;;  %3400 = vmatprep.subr.msk.mxu0 %vm265_vm0, %v3812_v29 }
  0x2c   : > { %3278 = vmatprep.mubr.msk.f32.mxu1 %vm216_vm1, %v3815_v30 }
  0x2d   : > { %3302 = vmatmul.mubr.msk.f32.gmra.mrb[10].mxu0 %vm216_vm1, %v3824_v31 }
  0x2e   : > { %3304 = vmatprep.mubr.msk.f32.mxu0 %vm216_vm1, %v3829_v32 }
  0x2f   : > { %3279 = vmatmul.mubr.msk.f32.gmra.mrb[12].mxu1 %vm216_vm1, %v3836_v33 }
  0x30   : > { %3281 = vmatprep.mubr.msk.f32.mxu1 %vm216_vm1, %v3839_v34 }
  0x31   : > { %3305 = vmatmul.mubr.msk.f32.gmra.mrb[12].mxu0 %vm216_vm1, %v3846_v35 }
  0x32   : > { %3307 = vmatprep.mubr.msk.f32.mxu0 %vm216_vm1, %v3851_v36 }
  0x33   : > { %3282 = vmatmul.mubr.msk.f32.gmra.mrb[14].mxu1 %vm216_vm1, %v3856_v37 }
  0x34   : > { %3284 = vmatprep.mubr.msk.f32.mxu1 %vm216_vm1, %v3859_v38 }
  0x35   : > { %3308 = vmatmul.mubr.msk.f32.gmra.mrb[14].mxu0 %vm216_vm1, %v3866_v39 }
  0x36   : > { %3310 = vmatprep.mubr.msk.f32.mxu0 %vm216_vm1, %v3871_v40 }
  0x37   : > { %3285 = vmatmul.mubr.msk.f32.gmra.mrb[16].mxu1 %vm216_vm1, %v3876_v41 }
  0x38   : > { %3287 = vmatprep.mubr.msk.f32.mxu1 %vm216_vm1, %v3879_v42 }
  0x39   : > { %3311 = vmatmul.mubr.msk.f32.gmra.mrb[16].mxu0 %vm216_vm1, %v3886_v43 }
  0x3a   : > { %3313 = vmatprep.mubr.msk.f32.mxu0 %vm216_vm1, %v3891_v44 }
  0x3b   : > { %3288 = vmatmul.mubr.msk.f32.gmra.mrb[18].mxu1 %vm216_vm1, %v3896_v45 }
  0x3c   : > { %3290 = vmatprep.mubr.msk.f32.mxu1 %vm216_vm1, %v3899_v46 }
  0x3d   : > { %3314 = vmatmul.mubr.msk.f32.gmra.mrb[18].mxu0 %vm216_vm1, %v3906_v47 }
  0x3e   : > { %3316 = vmatprep.mubr.msk.f32.mxu0 %vm216_vm1, %v3911_v48 }
  0x3f   : > { %3291 = vmatmul.mubr.msk.f32.gmra.mrb[20].mxu1 %vm216_vm1, %v3916_v49 }
  0x40   : > { %3293 = vmatprep.mubr.msk.f32.mxu1 %vm216_vm1, %v3919_v50 }
  0x41   : > { %3317 = vmatmul.mubr.msk.f32.gmra.mrb[20].mxu0 %vm216_vm1, %v3926_v51 }
  0x42   : > { %3319 = vmatprep.mubr.msk.f32.mxu0 %vm216_vm1, %v3931_v52 }
  0x43   : > { %3294 = vmatmul.mubr.msk.f32.gmra.mrb[22].mxu1 %vm216_vm1, %v3936_v53 }
  0x44   : > { %3324 = vmatprep.mubr.msk.f32.mxu1 %vm216_vm1, %v3721_v9 }
  0x45   : > { %3320 = vmatmul.mubr.msk.f32.gmra.mrb[22].mxu0 %vm216_vm1, %v3943_v54 }
  0x46   : > { %3350 = vmatprep.mubr.msk.f32.mxu0 %vm216_vm1, %v3788_v24 }
  0x47   : > { %3325 = vmatmul.mubr.msk.f32.vlgmr.msra.gmra.mrb[24].mxu1 %vm216_vm1, %v3741_v13 }
  0x48   : > { %3375 = vmatpush3.msk.msra.mxu1 %vm265_vm0, %v3797_v26  ;;  %3327 = vmatprep.mubr.msk.f32.mxu1 %vm216_vm1, %v3746_v14 }
  0x49   : > { %3351 = vmatmul.mubr.msk.f32.vlgmr.msra.gmra.mrb[24].mxu0 %vm216_vm1, %v3807_v28  ;;  %3426 = vmatprep.subr.msk.mxu1 %vm265_vm0, %v3020_v55 }
  0x4a   : > { %3401 = vmatpush3.msk.msra.mxu0 %vm265_vm0, %v3812_v29  ;;  %3353 = vmatprep.mubr.msk.f32.mxu0 %vm216_vm1, %v3815_v30 }
  0x4b   : > { %3328 = vmatmul.mubr.msk.f32.gmra.mrb[26].mxu1 %vm216_vm1, %v3762_v17  ;;  %3452 = vmatprep.subr.msk.mxu0 %vm265_vm0, %v3054_v56 }
  0x4c   : > { %3330 = vmatprep.mubr.msk.f32.mxu1 %vm216_vm1, %v3767_v18 }
  0x4d   : > { %3354 = vmatmul.mubr.msk.f32.gmra.mrb[26].mxu0 %vm216_vm1, %v3836_v33 }
  0x4e   : > { %3356 = vmatprep.mubr.msk.f32.mxu0 %vm216_vm1, %v3839_v34 }
  0x4f   : > { %3331 = vmatmul.mubr.msk.f32.gmra.mrb[28].mxu1 %vm216_vm1, %v3780_v21 }
  0x50   : > { %3333 = vmatprep.mubr.msk.f32.mxu1 %vm216_vm1, %v3702_v3 }
  0x51   : > { %3357 = vmatmul.mubr.msk.f32.gmra.mrb[28].mxu0 %vm216_vm1, %v3856_v37 }
  0x52   : > { %3359 = vmatprep.mubr.msk.f32.mxu0 %vm216_vm1, %v3859_v38 }
  0x53   : > { %3334 = vmatmul.mubr.msk.f32.gmra.mrb[30].mxu1 %vm216_vm1, %v3705_v4 }
  0x54   : > { %3336 = vmatprep.mubr.msk.f32.mxu1 %vm216_vm1, %v3708_v5 }
  0x55   : > { %3360 = vmatmul.mubr.msk.f32.gmra.mrb[30].mxu0 %vm216_vm1, %v3876_v41 }
  0x56   : > { %3362 = vmatprep.mubr.msk.f32.mxu0 %vm216_vm1, %v3879_v42 }
  0x57   : > { %3337 = vmatmul.mubr.msk.f32.gmra.mrb[32].mxu1 %vm216_vm1, %v3727_v10 }
  0x58   : > { %3339 = vmatprep.mubr.msk.f32.mxu1 %vm216_vm1, %v3733_v12 }
  0x59   : > { %3363 = vmatmul.mubr.msk.f32.gmra.mrb[32].mxu0 %vm216_vm1, %v3896_v45 }
  0x5a   : > { %3365 = vmatprep.mubr.msk.f32.mxu0 %vm216_vm1, %v3899_v46 }
  0x5b   : > { %3340 = vmatmul.mubr.msk.f32.gmra.mrb[34].mxu1 %vm216_vm1, %v3752_v15 }
  0x5c   : > { %3342 = vmatprep.mubr.msk.f32.mxu1 %vm216_vm1, %v3755_v16 }
  0x5d   : > { %3366 = vmatmul.mubr.msk.f32.gmra.mrb[34].mxu0 %vm216_vm1, %v3916_v49 }
  0x5e   : > { %3368 = vmatprep.mubr.msk.f32.mxu0 %vm216_vm1, %v3919_v50 }
  0x5f   : > { %3343 = vmatmul.mubr.msk.f32.gmra.mrb[36].mxu1 %vm216_vm1, %v3772_v19 }
  0x60   : > { %3345 = vmatprep.mubr.msk.f32.mxu1 %vm216_vm1, %v2880_v57 }
  0x61   : > { %3369 = vmatmul.mubr.msk.f32.gmra.mrb[36].mxu0 %vm216_vm1, %v3936_v53 }
  0x62   : > { %3371 = vmatprep.mubr.msk.f32.mxu0 %vm216_vm1, %v4017_v58 }
  0x63   : > { %3346 = vmatmul.mubr.msk.f32.gmra.mrb[38].mxu1 %vm216_vm1, %v2881_v59 }
  0x64   : > { %3376 = vmatprep.mubr.msk.f32.mxu1 %vm216_vm1, %v3801_v27 }
  0x65   : > { %3372 = vmatmul.mubr.msk.f32.gmra.mrb[38].mxu0 %vm216_vm1, %v4026_v60 }
  0x66   : > { %3402 = vmatprep.mubr.msk.f32.mxu0 %vm216_vm1, %v3746_v14 }
  0x67   : > { %3377 = vmatmul.mubr.msk.f32.vlgmr.msra.gmra.mrb[40].mxu1 %vm216_vm1, %v3824_v31 }
  0x68   : > { %3427 = vmatpush3.msk.msra.mxu1 %vm265_vm0, %v3020_v55  ;;  %3379 = vmatprep.mubr.msk.f32.mxu1 %vm216_vm1, %v3829_v32 }
  0x69   : > { %3403 = vmatmul.mubr.msk.f32.vlgmr.msra.gmra.mrb[40].mxu0 %vm216_vm1, %v3762_v17 }
  0x6a   : > { %3453 = vmatpush3.msk.msra.mxu0 %vm265_vm0, %v3054_v56  ;;  %3405 = vmatprep.mubr.msk.f32.mxu0 %vm216_vm1, %v3767_v18 }
  0x6b   : > { %3380 = vmatmul.mubr.msk.f32.gmra.mrb[42].mxu1 %vm216_vm1, %v3846_v35 }
  0x6c   : > { %3382 = vmatprep.mubr.msk.f32.mxu1 %vm216_vm1, %v3851_v36 }
  0x6d   : > { %3406 = vmatmul.mubr.msk.f32.gmra.mrb[42].mxu0 %vm216_vm1, %v3780_v21 }
  0x6e   : > { %3408 = vmatprep.mubr.msk.f32.mxu0 %vm216_vm1, %v3702_v3  ;;  %v3019_v3 = vld [vmem:[%s3699_s30 + $0xe1] sm:$0xff] }
  0x6f   : > { %3383 = vmatmul.mubr.msk.f32.gmra.mrb[44].mxu1 %vm216_vm1, %v3866_v39 }
  0x70   : > { %3385 = vmatprep.mubr.msk.f32.mxu1 %vm216_vm1, %v3871_v40 }
  0x71   : > { %3409 = vmatmul.mubr.msk.f32.gmra.mrb[44].mxu0 %vm216_vm1, %v3705_v4  ;;  %v3053_v4 = vld [vmem:[%s3699_s30 + $0xe2] sm:$0xff] }
  0x72   : > { %3411 = vmatprep.mubr.msk.f32.mxu0 %vm216_vm1, %v3708_v5 }
  0x73   : > { %3386 = vmatmul.mubr.msk.f32.gmra.mrb[46].mxu1 %vm216_vm1, %v3886_v43 }
  0x74   : > { %3388 = vmatprep.mubr.msk.f32.mxu1 %vm216_vm1, %v3891_v44 }
  0x75   : > { %3412 = vmatmul.mubr.msk.f32.gmra.mrb[46].mxu0 %vm216_vm1, %v3727_v10 }
  0x76   : > { %3414 = vmatprep.mubr.msk.f32.mxu0 %vm216_vm1, %v3733_v12 }
  0x77   : > { %3389 = vmatmul.mubr.msk.f32.gmra.mrb[48].mxu1 %vm216_vm1, %v3906_v47 }
  0x78   : > { %3391 = vmatprep.mubr.msk.f32.mxu1 %vm216_vm1, %v3911_v48 }
  0x79   : > { %3415 = vmatmul.mubr.msk.f32.gmra.mrb[48].mxu0 %vm216_vm1, %v3752_v15 }
  0x7a   : > { %3417 = vmatprep.mubr.msk.f32.mxu0 %vm216_vm1, %v3755_v16 }
  0x7b   : > { %3392 = vmatmul.mubr.msk.f32.gmra.mrb[50].mxu1 %vm216_vm1, %v3926_v51 }
  0x7c   : > { %3394 = vmatprep.mubr.msk.f32.mxu1 %vm216_vm1, %v3931_v52 }
  0x7d   : > { %3418 = vmatmul.mubr.msk.f32.gmra.mrb[50].mxu0 %vm216_vm1, %v3772_v19 }
  0x7e   : > { %3420 = vmatprep.mubr.msk.f32.mxu0 %vm216_vm1, %v2880_v57 }
  0x7f   : > { %3395 = vmatmul.mubr.msk.f32.gmra.mrb[52].mxu1 %vm216_vm1, %v3943_v54 }
  0x80   : > { %3397 = vmatprep.mubr.msk.f32.mxu1 %vm216_vm1, %v2948_v61 }
  0x81   : > { %3421 = vmatmul.mubr.msk.f32.gmra.mrb[52].mxu0 %vm216_vm1, %v2881_v59 }
  0x82   : > { %3423 = vmatprep.mubr.msk.f32.mxu0 %vm216_vm1, %v2984_v62 }
  0x83   : > { %3398 = vmatmul.mubr.msk.f32.gmra.mrb[54].mxu1 %vm216_vm1, %v2949_v63 }
  0x84   : > { %3428 = vmatprep.mubr.msk.f32.mxu1 %vm216_vm1, %v3815_v30 }
  0x85   : > { %3424 = vmatmul.mubr.msk.f32.gmra.mrb[54].mxu0 %vm216_vm1, %v2985_v0 }
  0x86   : > { %3454 = vmatprep.mubr.msk.f32.mxu0 %vm216_vm1, %v3829_v32 }
  0x87   : > { %3429 = vmatmul.mubr.msk.f32.vlgmr.msra.gmra.mrb[56].mxu1 %vm216_vm1, %v3836_v33 }
  0x88   : > { %3431 = vmatprep.mubr.msk.f32.mxu1 %vm216_vm1, %v3839_v34 }
  0x89   : > { %3455 = vmatmul.mubr.msk.f32.vlgmr.msra.gmra.mrb[56].mxu0 %vm216_vm1, %v3846_v35 }
  0x8a   : > { %3457 = vmatprep.mubr.msk.f32.mxu0 %vm216_vm1, %v3851_v36 }
  0x8b   : > { %3432 = vmatmul.mubr.msk.f32.gmra.mrb[58].mxu1 %vm216_vm1, %v3856_v37 }
  0x8c   : > { %3434 = vmatprep.mubr.msk.f32.mxu1 %vm216_vm1, %v3859_v38 }
  0x8d   : > { %3458 = vmatmul.mubr.msk.f32.gmra.mrb[58].mxu0 %vm216_vm1, %v3866_v39 }
  0x8e   : > { %3460 = vmatprep.mubr.msk.f32.mxu0 %vm216_vm1, %v3871_v40 }
  0x8f   : > { %3435 = vmatmul.mubr.msk.f32.gmra.mrb[60].mxu1 %vm216_vm1, %v3876_v41 }
  0x90   : > { %3437 = vmatprep.mubr.msk.f32.mxu1 %vm216_vm1, %v3879_v42 }
  0x91   : > { %3461 = vmatmul.mubr.msk.f32.gmra.mrb[60].mxu0 %vm216_vm1, %v3886_v43 }
  0x92   : > { %3463 = vmatprep.mubr.msk.f32.mxu0 %vm216_vm1, %v3891_v44 }
  0x93   : > { %3438 = vmatmul.mubr.msk.f32.gmra.mrb[62].mxu1 %vm216_vm1, %v3896_v45 }
  0x94   : > { %3440 = vmatprep.mubr.msk.f32.mxu1 %vm216_vm1, %v3899_v46 }
  0x95   : > { %3464 = vmatmul.mubr.msk.f32.gmra.mrb[62].mxu0 %vm216_vm1, %v3906_v47 }
  0x96   : > { %3466 = vmatprep.mubr.msk.f32.mxu0 %vm216_vm1, %v3911_v48 }
  0x97   : > { %3441 = vmatmul.mubr.msk.f32.gmra.mrb[64].mxu1 %vm216_vm1, %v3916_v49 }
  0x98   : > { %3443 = vmatprep.mubr.msk.f32.mxu1 %vm216_vm1, %v3919_v50 }
  0x99   : > { %3467 = vmatmul.mubr.msk.f32.gmra.mrb[64].mxu0 %vm216_vm1, %v3926_v51 }
  0x9a   : > { %3469 = vmatprep.mubr.msk.f32.mxu0 %vm216_vm1, %v3931_v52 }
  0x9b   : > { %3444 = vmatmul.mubr.msk.f32.gmra.mrb[66].mxu1 %vm216_vm1, %v3936_v53 }
  0x9c   : > { %3446 = vmatprep.mubr.msk.f32.mxu1 %vm216_vm1, %v4017_v58 }
  0x9d   : > { %3470 = vmatmul.mubr.msk.f32.gmra.mrb[66].mxu0 %vm216_vm1, %v3943_v54 }
  0x9e   : > { %3472 = vmatprep.mubr.msk.f32.mxu0 %vm216_vm1, %v2948_v61 }
  0x9f   : > { %3447 = vmatmul.mubr.msk.f32.gmra.mrb[68].mxu1 %vm216_vm1, %v4026_v60 }
  0xa0   : > { %3449 = vmatprep.mubr.msk.f32.mxu1 %vm216_vm1, %v3018_v1 }
  0xa1   : > { %3473 = vmatmul.mubr.msk.f32.gmra.mrb[68].mxu0 %vm216_vm1, %v2949_v63 }
  0xa2   : > { %3475 = vmatprep.mubr.msk.f32.mxu0 %vm216_vm1, %v3052_v2 }
  0xa3   : > { %3450 = vmatmul.mubr.msk.f32.gmra.mrb[70].mxu1 %vm216_vm1, %v3019_v3 }
  0xa5   : > { %3476 = vmatmul.mubr.msk.f32.gmra.mrb[70].mxu0 %vm216_vm1, %v3053_v4 }
  0xea   : > { %v3260_v5 = vpop.f32.mrb[0].mxu1 }
  0xeb   : > { %423 = vst.msk [vmem:[#allocation2 + $0x48] sm:$0xff] %vm216_vm1, %v3260_v5  ;;  %v375_v6 = vpop.f32.mrb[1].mxu1 }
  0xec   : > { %422 = vst.msk [vmem:[#allocation2 + $0x40] sm:$0xff] %vm216_vm1, %v375_v6  ;;  %v3248_v7 = vpop.f32.mrb[0].mxu0 }
  0xed   : > { %415 = vst.msk [vmem:[#allocation2 + $0x8] sm:$0xff] %vm216_vm1, %v3248_v7  ;;  %v335_v8 = vpop.f32.mrb[1].mxu0 }
  0xee   : > { %v3263_v9 = vpop.f32.mrb[2].mxu1  ;;  %414 = vst.msk [vmem:[#allocation2] sm:$0xff] %vm216_vm1, %v335_v8 }
  0xef   : > { %425 = vst.msk [vmem:[#allocation2 + $0x58] sm:$0xff] %vm216_vm1, %v3263_v9  ;;  %v385_v10 = vpop.f32.mrb[3].mxu1 }
  0xf0   : > { %424 = vst.msk [vmem:[#allocation2 + $0x50] sm:$0xff] %vm216_vm1, %v385_v10  ;;  %v3251_v11 = vpop.f32.mrb[2].mxu0 }
  0xf1   : > { %417 = vst.msk [vmem:[#allocation2 + $0x18] sm:$0xff] %vm216_vm1, %v3251_v11  ;;  %v345_v12 = vpop.f32.mrb[3].mxu0 }
  0xf2   : > { %v3266_v13 = vpop.f32.mrb[4].mxu1  ;;  %416 = vst.msk [vmem:[#allocation2 + $0x10] sm:$0xff] %vm216_vm1, %v345_v12  ;;  %v653_v62 = vld [vmem:[#allocation2 + $0x48] sm:$0xff] }
  0xf3   : > { %427 = vst.msk [vmem:[#allocation2 + $0x68] sm:$0xff] %vm216_vm1, %v3266_v13  ;;  %v395_v14 = vpop.f32.mrb[5].mxu1  ;;  %v652_v1 = vld [vmem:[#allocation2 + $0x40] sm:$0xff] }
  0xf4   : > { %426 = vst.msk [vmem:[#allocation2 + $0x60] sm:$0xff] %vm216_vm1, %v395_v14  ;;  %v3254_v15 = vpop.f32.mrb[4].mxu0  ;;  %v645_v19 = vld [vmem:[#allocation2 + $0x8] sm:$0xff] }
  0xf5   : > { %419 = vst.msk [vmem:[#allocation2 + $0x28] sm:$0xff] %vm216_vm1, %v3254_v15  ;;  %v355_v16 = vpop.f32.mrb[5].mxu0  ;;  %v644_v21 = vld [vmem:[#allocation2] sm:$0xff] }
  0xf6   : > { %v3269_v17 = vpop.f32.mrb[6].mxu1  ;;  %418 = vst.msk [vmem:[#allocation2 + $0x20] sm:$0xff] %vm216_vm1, %v355_v16  ;;  %v655_v10 = vld [vmem:[#allocation2 + $0x58] sm:$0xff] }
  0xf7   : > { %429 = vst.msk [vmem:[#allocation2 + $0x78] sm:$0xff] %vm216_vm1, %v3269_v17  ;;  %v405_v18 = vpop.f32.mrb[7].mxu1  ;;  %v654_v13 = vld [vmem:[#allocation2 + $0x50] sm:$0xff] }
  0xf8   : > { %428 = vst.msk [vmem:[#allocation2 + $0x70] sm:$0xff] %vm216_vm1, %v405_v18  ;;  %v3257_v20 = vpop.f32.mrb[6].mxu0  ;;  %v647_v27 = vld [vmem:[#allocation2 + $0x18] sm:$0xff] }
  0xf9   : > { %421 = vst.msk [vmem:[#allocation2 + $0x38] sm:$0xff] %vm216_vm1, %v3257_v20  ;;  %v365_v22 = vpop.f32.mrb[7].mxu0  ;;  %v646_v29 = vld [vmem:[#allocation2 + $0x10] sm:$0xff] }
  0xfa   : > { %v3274_v23 = vpop.f32.mrb[8].mxu1  ;;  %420 = vst.msk [vmem:[#allocation2 + $0x30] sm:$0xff] %vm216_vm1, %v365_v22  ;;  %v657_v22 = vld [vmem:[#allocation2 + $0x68] sm:$0xff] }
  0xfb   : > { %v661_v24 = vadd.f32 %v3274_v23, %v645_v19  ;;  %v565_v25 = vpop.f32.mrb[9].mxu1 }
  0xfc   : > { %v660_v26 = vadd.f32 %v644_v21, %v565_v25  ;;  %v3300_v28 = vpop.f32.mrb[8].mxu0  ;;  %v649_v35 = vld [vmem:[#allocation2 + $0x28] sm:$0xff]  ;;  %v656_v25 = vld [vmem:[#allocation2 + $0x60] sm:$0xff] }
  0xfd   : > { %677 = vst.msk [vmem:[#allocation2 + $0x8] sm:$0xff] %vm216_vm1, %v661_v24  ;;  %v827_v30 = vpop.f32.mrb[9].mxu0  ;;  %v648_v37 = vld [vmem:[#allocation2 + $0x20] sm:$0xff] }
  0xfe   : > { %676 = vst.msk [vmem:[#allocation2] sm:$0xff] %vm216_vm1, %v660_v26  ;;  %v3277_v31 = vpop.f32.mrb[10].mxu1 }
  0xff   : > { %v663_v32 = vadd.f32 %v3277_v31, %v647_v27  ;;  %v575_v33 = vpop.f32.mrb[11].mxu1 }
 0x100   : > { %v662_v34 = vadd.f32 %v646_v29, %v575_v33  ;;  %v3303_v36 = vpop.f32.mrb[10].mxu0  ;;  %v651_v44 = vld [vmem:[#allocation2 + $0x38] sm:$0xff] }
 0x101   : > { %679 = vst.msk [vmem:[#allocation2 + $0x18] sm:$0xff] %vm216_vm1, %v663_v32  ;;  %v837_v38 = vpop.f32.mrb[11].mxu0  ;;  %v650_v48 = vld [vmem:[#allocation2 + $0x30] sm:$0xff] }
 0x102   : > { %678 = vst.msk [vmem:[#allocation2 + $0x10] sm:$0xff] %vm216_vm1, %v662_v34  ;;  %v3280_v39 = vpop.f32.mrb[12].mxu1  ;;  %v659_v34 = vld [vmem:[#allocation2 + $0x78] sm:$0xff] }
 0x103   : > { %v665_v40 = vadd.f32 %v3280_v39, %v649_v35  ;;  %v585_v41 = vpop.f32.mrb[13].mxu1 }
 0x104   : > { %v664_v42 = vadd.f32 %v648_v37, %v585_v41  ;;  %v907_v43 = vld [vmem:[#allocation2 + $0x8] sm:$0xff]  ;;  %v3306_v45 = vpop.f32.mrb[12].mxu0  ;;  %v658_v37 = vld [vmem:[#allocation2 + $0x70] sm:$0xff] }
 0x105   : > { %681 = vst.msk [vmem:[#allocation2 + $0x28] sm:$0xff] %vm216_vm1, %v665_v40  ;;  %v923_v46 = vadd.f32 %v3300_v28, %v907_v43  ;;  %v906_v47 = vld [vmem:[#allocation2] sm:$0xff]  ;;  %v847_v49 = vpop.f32.mrb[13].mxu0 }
 0x106   : > { %680 = vst.msk [vmem:[#allocation2 + $0x20] sm:$0xff] %vm216_vm1, %v664_v42  ;;  %v922_v50 = vadd.f32 %v906_v47, %v827_v30  ;;  %v3283_v51 = vpop.f32.mrb[14].mxu1 }
 0x107   : > { %939 = vst.msk [vmem:[#allocation2 + $0x8] sm:$0xff] %vm216_vm1, %v923_v46  ;;  %v667_v52 = vadd.f32 %v3283_v51, %v651_v44  ;;  %v595_v53 = vpop.f32.mrb[15].mxu1 }
 0x108   : > { %938 = vst.msk [vmem:[#allocation2] sm:$0xff] %vm216_vm1, %v922_v50  ;;  %v666_v54 = vadd.f32 %v650_v48, %v595_v53  ;;  %v909_v55 = vld [vmem:[#allocation2 + $0x18] sm:$0xff]  ;;  %v3309_v56 = vpop.f32.mrb[14].mxu0 }
 0x109   : > { %683 = vst.msk [vmem:[#allocation2 + $0x38] sm:$0xff] %vm216_vm1, %v667_v52  ;;  %v925_v57 = vadd.f32 %v3303_v36, %v909_v55  ;;  %v908_v58 = vld [vmem:[#allocation2 + $0x10] sm:$0xff]  ;;  %v857_v59 = vpop.f32.mrb[15].mxu0 }
 0x10a   : > { %682 = vst.msk [vmem:[#allocation2 + $0x30] sm:$0xff] %vm216_vm1, %v666_v54  ;;  %v924_v60 = vadd.f32 %v908_v58, %v837_v38  ;;  %v3286_v61 = vpop.f32.mrb[16].mxu1 }
 0x10b   : > { %941 = vst.msk [vmem:[#allocation2 + $0x18] sm:$0xff] %vm216_vm1, %v925_v57  ;;  %v669_v63 = vadd.f32 %v3286_v61, %v653_v62  ;;  %v605_v0 = vpop.f32.mrb[17].mxu1 }
 0x10c   : > { %940 = vst.msk [vmem:[#allocation2 + $0x10] sm:$0xff] %vm216_vm1, %v924_v60  ;;  %v668_v2 = vadd.f32 %v652_v1, %v605_v0  ;;  %v911_v3 = vld [vmem:[#allocation2 + $0x28] sm:$0xff]  ;;  %v3312_v4 = vpop.f32.mrb[16].mxu0 }
 0x10d   : > { %685 = vst.msk [vmem:[#allocation2 + $0x48] sm:$0xff] %vm216_vm1, %v669_v63  ;;  %v927_v5 = vadd.f32 %v3306_v45, %v911_v3  ;;  %v910_v6 = vld [vmem:[#allocation2 + $0x20] sm:$0xff]  ;;  %v867_v7 = vpop.f32.mrb[17].mxu0 }
 0x10e   : > { %684 = vst.msk [vmem:[#allocation2 + $0x40] sm:$0xff] %vm216_vm1, %v668_v2  ;;  %v926_v8 = vadd.f32 %v910_v6, %v847_v49  ;;  %v3289_v9 = vpop.f32.mrb[18].mxu1  ;;  %v1172_v46 = vld [vmem:[#allocation2 + $0x8] sm:$0xff] }
 0x10f   : > { %943 = vst.msk [vmem:[#allocation2 + $0x28] sm:$0xff] %vm216_vm1, %v927_v5  ;;  %v671_v11 = vadd.f32 %v3289_v9, %v655_v10  ;;  %v615_v12 = vpop.f32.mrb[19].mxu1  ;;  %v1171_v49 = vld [vmem:[#allocation2] sm:$0xff] }
 0x110   : > { %942 = vst.msk [vmem:[#allocation2 + $0x20] sm:$0xff] %vm216_vm1, %v926_v8  ;;  %v670_v14 = vadd.f32 %v654_v13, %v615_v12  ;;  %v913_v15 = vld [vmem:[#allocation2 + $0x38] sm:$0xff]  ;;  %v3315_v16 = vpop.f32.mrb[18].mxu0 }
 0x111   : > { %687 = vst.msk [vmem:[#allocation2 + $0x58] sm:$0xff] %vm216_vm1, %v671_v11  ;;  %v929_v17 = vadd.f32 %v3309_v56, %v913_v15  ;;  %v912_v18 = vld [vmem:[#allocation2 + $0x30] sm:$0xff]  ;;  %v877_v19 = vpop.f32.mrb[19].mxu0 }
 0x112   : > { %686 = vst.msk [vmem:[#allocation2 + $0x50] sm:$0xff] %vm216_vm1, %v670_v14  ;;  %v928_v20 = vadd.f32 %v912_v18, %v857_v59  ;;  %v3292_v21 = vpop.f32.mrb[20].mxu1  ;;  %v1174_v58 = vld [vmem:[#allocation2 + $0x18] sm:$0xff] }
 0x113   : > { %945 = vst.msk [vmem:[#allocation2 + $0x38] sm:$0xff] %vm216_vm1, %v929_v17  ;;  %v673_v23 = vadd.f32 %v3292_v21, %v657_v22  ;;  %v625_v24 = vpop.f32.mrb[21].mxu1  ;;  %v1173_v61 = vld [vmem:[#allocation2 + $0x10] sm:$0xff] }
 0x114   : > { %944 = vst.msk [vmem:[#allocation2 + $0x30] sm:$0xff] %vm216_vm1, %v928_v20  ;;  %v672_v26 = vadd.f32 %v656_v25, %v625_v24  ;;  %v915_v27 = vld [vmem:[#allocation2 + $0x48] sm:$0xff]  ;;  %v3318_v28 = vpop.f32.mrb[20].mxu0 }
 0x115   : > { %689 = vst.msk [vmem:[#allocation2 + $0x68] sm:$0xff] %vm216_vm1, %v673_v23  ;;  %v931_v29 = vadd.f32 %v3312_v4, %v915_v27  ;;  %v914_v30 = vld [vmem:[#allocation2 + $0x40] sm:$0xff]  ;;  %v887_v31 = vpop.f32.mrb[21].mxu0 }
 0x116   : > { %688 = vst.msk [vmem:[#allocation2 + $0x60] sm:$0xff] %vm216_vm1, %v672_v26  ;;  %v930_v32 = vadd.f32 %v914_v30, %v867_v7  ;;  %v3295_v33 = vpop.f32.mrb[22].mxu1  ;;  %v1176_v6 = vld [vmem:[#allocation2 + $0x28] sm:$0xff] }
 0x117   : > { %947 = vst.msk [vmem:[#allocation2 + $0x48] sm:$0xff] %vm216_vm1, %v931_v29  ;;  %v675_v35 = vadd.f32 %v3295_v33, %v659_v34  ;;  %v635_v36 = vpop.f32.mrb[23].mxu1  ;;  %v1175_v9 = vld [vmem:[#allocation2 + $0x20] sm:$0xff] }
 0x118   : > { %946 = vst.msk [vmem:[#allocation2 + $0x40] sm:$0xff] %vm216_vm1, %v930_v32  ;;  %v674_v38 = vadd.f32 %v658_v37, %v635_v36  ;;  %v917_v39 = vld [vmem:[#allocation2 + $0x58] sm:$0xff]  ;;  %v3321_v40 = vpop.f32.mrb[22].mxu0 }
 0x119   : > { %691 = vst.msk [vmem:[#allocation2 + $0x78] sm:$0xff] %vm216_vm1, %v675_v35  ;;  %v933_v41 = vadd.f32 %v3315_v16, %v917_v39  ;;  %v916_v42 = vld [vmem:[#allocation2 + $0x50] sm:$0xff]  ;;  %v897_v43 = vpop.f32.mrb[23].mxu0 }
 0x11a   : > { %690 = vst.msk [vmem:[#allocation2 + $0x70] sm:$0xff] %vm216_vm1, %v674_v38  ;;  %v932_v44 = vadd.f32 %v916_v42, %v877_v19  ;;  %v3326_v45 = vpop.f32.mrb[24].mxu1  ;;  %v1178_v18 = vld [vmem:[#allocation2 + $0x38] sm:$0xff] }
 0x11b   : > { %949 = vst.msk [vmem:[#allocation2 + $0x58] sm:$0xff] %vm216_vm1, %v933_v41  ;;  %v1188_v47 = vadd.f32 %v3326_v45, %v1172_v46  ;;  %v1092_v48 = vpop.f32.mrb[25].mxu1  ;;  %v1177_v21 = vld [vmem:[#allocation2 + $0x30] sm:$0xff] }
 0x11c   : > { %948 = vst.msk [vmem:[#allocation2 + $0x50] sm:$0xff] %vm216_vm1, %v932_v44  ;;  %v919_v50 = vld [vmem:[#allocation2 + $0x68] sm:$0xff]  ;;  %v1187_v51 = vadd.f32 %v1171_v49, %v1092_v48  ;;  %v3352_v52 = vpop.f32.mrb[24].mxu0 }
 0x11d   : > { %1204 = vst.msk [vmem:[#allocation2 + $0x8] sm:$0xff] %vm216_vm1, %v1188_v47  ;;  %v935_v53 = vadd.f32 %v3318_v28, %v919_v50  ;;  %v918_v54 = vld [vmem:[#allocation2 + $0x60] sm:$0xff]  ;;  %v1354_v55 = vpop.f32.mrb[25].mxu0 }
 0x11e   : > { %1203 = vst.msk [vmem:[#allocation2] sm:$0xff] %vm216_vm1, %v1187_v51  ;;  %v934_v56 = vadd.f32 %v918_v54, %v887_v31  ;;  %v3329_v57 = vpop.f32.mrb[26].mxu1  ;;  %v1180_v30 = vld [vmem:[#allocation2 + $0x48] sm:$0xff] }
 0x11f   : > { %951 = vst.msk [vmem:[#allocation2 + $0x68] sm:$0xff] %vm216_vm1, %v935_v53  ;;  %v1190_v59 = vadd.f32 %v3329_v57, %v1174_v58  ;;  %v1102_v60 = vpop.f32.mrb[27].mxu1  ;;  %v1179_v33 = vld [vmem:[#allocation2 + $0x40] sm:$0xff] }
 0x120   : > { %950 = vst.msk [vmem:[#allocation2 + $0x60] sm:$0xff] %vm216_vm1, %v934_v56  ;;  %v921_v62 = vld [vmem:[#allocation2 + $0x78] sm:$0xff]  ;;  %v1189_v63 = vadd.f32 %v1173_v61, %v1102_v60  ;;  %v3355_v0 = vpop.f32.mrb[26].mxu0 }
 0x121   : > { %1206 = vst.msk [vmem:[#allocation2 + $0x18] sm:$0xff] %vm216_vm1, %v1190_v59  ;;  %v937_v1 = vadd.f32 %v3321_v40, %v921_v62  ;;  %v920_v2 = vld [vmem:[#allocation2 + $0x70] sm:$0xff]  ;;  %v1364_v3 = vpop.f32.mrb[27].mxu0 }
 0x122   : > { %1205 = vst.msk [vmem:[#allocation2 + $0x10] sm:$0xff] %vm216_vm1, %v1189_v63  ;;  %v936_v4 = vadd.f32 %v920_v2, %v897_v43  ;;  %v3332_v5 = vpop.f32.mrb[28].mxu1  ;;  %v1182_v42 = vld [vmem:[#allocation2 + $0x58] sm:$0xff] }
 0x123   : > { %953 = vst.msk [vmem:[#allocation2 + $0x78] sm:$0xff] %vm216_vm1, %v937_v1  ;;  %v1192_v7 = vadd.f32 %v3332_v5, %v1176_v6  ;;  %v1112_v8 = vpop.f32.mrb[29].mxu1  ;;  %v1181_v45 = vld [vmem:[#allocation2 + $0x50] sm:$0xff] }
 0x124   : > { %952 = vst.msk [vmem:[#allocation2 + $0x70] sm:$0xff] %vm216_vm1, %v936_v4  ;;  %v1191_v10 = vadd.f32 %v1175_v9, %v1112_v8  ;;  %v1434_v11 = vld [vmem:[#allocation2 + $0x8] sm:$0xff]  ;;  %v3358_v12 = vpop.f32.mrb[28].mxu0 }
 0x125   : > { %1208 = vst.msk [vmem:[#allocation2 + $0x28] sm:$0xff] %vm216_vm1, %v1192_v7  ;;  %v1450_v13 = vadd.f32 %v3352_v52, %v1434_v11  ;;  %v1433_v14 = vld [vmem:[#allocation2] sm:$0xff]  ;;  %v1374_v15 = vpop.f32.mrb[29].mxu0 }
 0x126   : > { %1207 = vst.msk [vmem:[#allocation2 + $0x20] sm:$0xff] %vm216_vm1, %v1191_v10  ;;  %v1449_v16 = vadd.f32 %v1433_v14, %v1354_v55  ;;  %v3335_v17 = vpop.f32.mrb[30].mxu1  ;;  %v1184_v54 = vld [vmem:[#allocation2 + $0x68] sm:$0xff] }
 0x127   : > { %1466 = vst.msk [vmem:[#allocation2 + $0x8] sm:$0xff] %vm216_vm1, %v1450_v13  ;;  %v1194_v19 = vadd.f32 %v3335_v17, %v1178_v18  ;;  %v1122_v20 = vpop.f32.mrb[31].mxu1  ;;  %v1183_v57 = vld [vmem:[#allocation2 + $0x60] sm:$0xff] }
 0x128   : > { %1465 = vst.msk [vmem:[#allocation2] sm:$0xff] %vm216_vm1, %v1449_v16  ;;  %v1193_v22 = vadd.f32 %v1177_v21, %v1122_v20  ;;  %v1436_v23 = vld [vmem:[#allocation2 + $0x18] sm:$0xff]  ;;  %v3361_v24 = vpop.f32.mrb[30].mxu0 }
 0x129   : > { %1210 = vst.msk [vmem:[#allocation2 + $0x38] sm:$0xff] %vm216_vm1, %v1194_v19  ;;  %v1452_v25 = vadd.f32 %v3355_v0, %v1436_v23  ;;  %v1435_v26 = vld [vmem:[#allocation2 + $0x10] sm:$0xff]  ;;  %v1384_v27 = vpop.f32.mrb[31].mxu0 }
 0x12a   : > { %1209 = vst.msk [vmem:[#allocation2 + $0x30] sm:$0xff] %vm216_vm1, %v1193_v22  ;;  %v1451_v28 = vadd.f32 %v1435_v26, %v1364_v3  ;;  %v3338_v29 = vpop.f32.mrb[32].mxu1  ;;  %v1186_v2 = vld [vmem:[#allocation2 + $0x78] sm:$0xff] }
 0x12b   : > { %1468 = vst.msk [vmem:[#allocation2 + $0x18] sm:$0xff] %vm216_vm1, %v1452_v25  ;;  %v1196_v31 = vadd.f32 %v3338_v29, %v1180_v30  ;;  %v1132_v32 = vpop.f32.mrb[33].mxu1  ;;  %v1185_v5 = vld [vmem:[#allocation2 + $0x70] sm:$0xff] }
 0x12c   : > { %1467 = vst.msk [vmem:[#allocation2 + $0x10] sm:$0xff] %vm216_vm1, %v1451_v28  ;;  %v1195_v34 = vadd.f32 %v1179_v33, %v1132_v32  ;;  %v1438_v35 = vld [vmem:[#allocation2 + $0x28] sm:$0xff]  ;;  %v3364_v36 = vpop.f32.mrb[32].mxu0 }
 0x12d   : > { %1212 = vst.msk [vmem:[#allocation2 + $0x48] sm:$0xff] %vm216_vm1, %v1196_v31  ;;  %v1454_v37 = vadd.f32 %v3358_v12, %v1438_v35  ;;  %v1437_v38 = vld [vmem:[#allocation2 + $0x20] sm:$0xff]  ;;  %v1394_v39 = vpop.f32.mrb[33].mxu0 }
 0x12e   : > { %1211 = vst.msk [vmem:[#allocation2 + $0x40] sm:$0xff] %vm216_vm1, %v1195_v34  ;;  %v1453_v40 = vadd.f32 %v1437_v38, %v1374_v15  ;;  %v3341_v41 = vpop.f32.mrb[34].mxu1  ;;  %v1696_v14 = vld [vmem:[#allocation2 + $0x8] sm:$0xff] }
 0x12f   : > { %1470 = vst.msk [vmem:[#allocation2 + $0x28] sm:$0xff] %vm216_vm1, %v1454_v37  ;;  %v1198_v43 = vadd.f32 %v3341_v41, %v1182_v42  ;;  %v1142_v44 = vpop.f32.mrb[35].mxu1  ;;  %v1695_v17 = vld [vmem:[#allocation2] sm:$0xff] }
 0x130   : > { %1469 = vst.msk [vmem:[#allocation2 + $0x20] sm:$0xff] %vm216_vm1, %v1453_v40  ;;  %v1197_v46 = vadd.f32 %v1181_v45, %v1142_v44  ;;  %v1440_v47 = vld [vmem:[#allocation2 + $0x38] sm:$0xff]  ;;  %v3367_v48 = vpop.f32.mrb[34].mxu0 }
 0x131   : > { %1214 = vst.msk [vmem:[#allocation2 + $0x58] sm:$0xff] %vm216_vm1, %v1198_v43  ;;  %v1456_v49 = vadd.f32 %v3361_v24, %v1440_v47  ;;  %v1439_v50 = vld [vmem:[#allocation2 + $0x30] sm:$0xff]  ;;  %v1404_v51 = vpop.f32.mrb[35].mxu0 }
 0x132   : > { %1213 = vst.msk [vmem:[#allocation2 + $0x50] sm:$0xff] %vm216_vm1, %v1197_v46  ;;  %v1455_v52 = vadd.f32 %v1439_v50, %v1384_v27  ;;  %v3344_v53 = vpop.f32.mrb[36].mxu1  ;;  %v1698_v26 = vld [vmem:[#allocation2 + $0x18] sm:$0xff] }
 0x133   : > { %1472 = vst.msk [vmem:[#allocation2 + $0x38] sm:$0xff] %vm216_vm1, %v1456_v49  ;;  %v1200_v55 = vadd.f32 %v3344_v53, %v1184_v54  ;;  %v1152_v56 = vpop.f32.mrb[37].mxu1  ;;  %v1697_v29 = vld [vmem:[#allocation2 + $0x10] sm:$0xff] }
 0x134   : > { %1471 = vst.msk [vmem:[#allocation2 + $0x30] sm:$0xff] %vm216_vm1, %v1455_v52  ;;  %v1199_v58 = vadd.f32 %v1183_v57, %v1152_v56  ;;  %v1442_v59 = vld [vmem:[#allocation2 + $0x48] sm:$0xff]  ;;  %v3370_v60 = vpop.f32.mrb[36].mxu0 }
 0x135   : > { %1216 = vst.msk [vmem:[#allocation2 + $0x68] sm:$0xff] %vm216_vm1, %v1200_v55  ;;  %v1458_v61 = vadd.f32 %v3364_v36, %v1442_v59  ;;  %v1441_v62 = vld [vmem:[#allocation2 + $0x40] sm:$0xff]  ;;  %v1414_v63 = vpop.f32.mrb[37].mxu0 }
 0x136   : > { %1215 = vst.msk [vmem:[#allocation2 + $0x60] sm:$0xff] %vm216_vm1, %v1199_v58  ;;  %v1457_v0 = vadd.f32 %v1441_v62, %v1394_v39  ;;  %v3347_v1 = vpop.f32.mrb[38].mxu1  ;;  %v1700_v38 = vld [vmem:[#allocation2 + $0x28] sm:$0xff] }
 0x137   : > { %1474 = vst.msk [vmem:[#allocation2 + $0x48] sm:$0xff] %vm216_vm1, %v1458_v61  ;;  %v1202_v3 = vadd.f32 %v3347_v1, %v1186_v2  ;;  %v1162_v4 = vpop.f32.mrb[39].mxu1  ;;  %v1699_v41 = vld [vmem:[#allocation2 + $0x20] sm:$0xff] }
 0x138   : > { %1473 = vst.msk [vmem:[#allocation2 + $0x40] sm:$0xff] %vm216_vm1, %v1457_v0  ;;  %v1201_v6 = vadd.f32 %v1185_v5, %v1162_v4  ;;  %v1444_v7 = vld [vmem:[#allocation2 + $0x58] sm:$0xff]  ;;  %v3373_v8 = vpop.f32.mrb[38].mxu0 }
 0x139   : > { %1218 = vst.msk [vmem:[#allocation2 + $0x78] sm:$0xff] %vm216_vm1, %v1202_v3  ;;  %v1460_v9 = vadd.f32 %v3367_v48, %v1444_v7  ;;  %v1443_v10 = vld [vmem:[#allocation2 + $0x50] sm:$0xff]  ;;  %v1424_v11 = vpop.f32.mrb[39].mxu0 }
 0x13a   : > { %1217 = vst.msk [vmem:[#allocation2 + $0x70] sm:$0xff] %vm216_vm1, %v1201_v6  ;;  %v1459_v12 = vadd.f32 %v1443_v10, %v1404_v51  ;;  %v3378_v13 = vpop.f32.mrb[40].mxu1  ;;  %v1702_v50 = vld [vmem:[#allocation2 + $0x38] sm:$0xff] }
 0x13b   : > { %1476 = vst.msk [vmem:[#allocation2 + $0x58] sm:$0xff] %vm216_vm1, %v1460_v9  ;;  %v1712_v15 = vadd.f32 %v3378_v13, %v1696_v14  ;;  %v1616_v16 = vpop.f32.mrb[41].mxu1  ;;  %v1701_v53 = vld [vmem:[#allocation2 + $0x30] sm:$0xff] }
 0x13c   : > { %1475 = vst.msk [vmem:[#allocation2 + $0x50] sm:$0xff] %vm216_vm1, %v1459_v12  ;;  %v1446_v18 = vld [vmem:[#allocation2 + $0x68] sm:$0xff]  ;;  %v1711_v19 = vadd.f32 %v1695_v17, %v1616_v16  ;;  %v3404_v20 = vpop.f32.mrb[40].mxu0 }
 0x13d   : > { %1728 = vst.msk [vmem:[#allocation2 + $0x8] sm:$0xff] %vm216_vm1, %v1712_v15  ;;  %v1462_v21 = vadd.f32 %v3370_v60, %v1446_v18  ;;  %v1445_v22 = vld [vmem:[#allocation2 + $0x60] sm:$0xff]  ;;  %v1881_v23 = vpop.f32.mrb[41].mxu0 }
 0x13e   : > { %1727 = vst.msk [vmem:[#allocation2] sm:$0xff] %vm216_vm1, %v1711_v19  ;;  %v1461_v24 = vadd.f32 %v1445_v22, %v1414_v63  ;;  %v3381_v25 = vpop.f32.mrb[42].mxu1  ;;  %v1704_v62 = vld [vmem:[#allocation2 + $0x48] sm:$0xff] }
 0x13f   : > { %1478 = vst.msk [vmem:[#allocation2 + $0x68] sm:$0xff] %vm216_vm1, %v1462_v21  ;;  %v1714_v27 = vadd.f32 %v3381_v25, %v1698_v26  ;;  %v1626_v28 = vpop.f32.mrb[43].mxu1  ;;  %v1703_v1 = vld [vmem:[#allocation2 + $0x40] sm:$0xff] }
 0x140   : > { %1477 = vst.msk [vmem:[#allocation2 + $0x60] sm:$0xff] %vm216_vm1, %v1461_v24  ;;  %v1448_v30 = vld [vmem:[#allocation2 + $0x78] sm:$0xff]  ;;  %v1713_v31 = vadd.f32 %v1697_v29, %v1626_v28  ;;  %v3407_v32 = vpop.f32.mrb[42].mxu0 }
 0x141   : > { %1730 = vst.msk [vmem:[#allocation2 + $0x18] sm:$0xff] %vm216_vm1, %v1714_v27  ;;  %v1464_v33 = vadd.f32 %v3373_v8, %v1448_v30  ;;  %v1447_v34 = vld [vmem:[#allocation2 + $0x70] sm:$0xff]  ;;  %v1891_v35 = vpop.f32.mrb[43].mxu0 }
 0x142   : > { %1729 = vst.msk [vmem:[#allocation2 + $0x10] sm:$0xff] %vm216_vm1, %v1713_v31  ;;  %v1463_v36 = vadd.f32 %v1447_v34, %v1424_v11  ;;  %v3384_v37 = vpop.f32.mrb[44].mxu1  ;;  %v1706_v10 = vld [vmem:[#allocation2 + $0x58] sm:$0xff] }
 0x143   : > { %1480 = vst.msk [vmem:[#allocation2 + $0x78] sm:$0xff] %vm216_vm1, %v1464_v33  ;;  %v1716_v39 = vadd.f32 %v3384_v37, %v1700_v38  ;;  %v1636_v40 = vpop.f32.mrb[45].mxu1  ;;  %v1705_v13 = vld [vmem:[#allocation2 + $0x50] sm:$0xff] }
 0x144   : > { %1479 = vst.msk [vmem:[#allocation2 + $0x70] sm:$0xff] %vm216_vm1, %v1463_v36  ;;  %v1715_v42 = vadd.f32 %v1699_v41, %v1636_v40  ;;  %v1961_v43 = vld [vmem:[#allocation2 + $0x8] sm:$0xff]  ;;  %v3410_v44 = vpop.f32.mrb[44].mxu0 }
 0x145   : > { %1732 = vst.msk [vmem:[#allocation2 + $0x28] sm:$0xff] %vm216_vm1, %v1716_v39  ;;  %v1977_v45 = vadd.f32 %v3404_v20, %v1961_v43  ;;  %v1960_v46 = vld [vmem:[#allocation2] sm:$0xff]  ;;  %v1901_v47 = vpop.f32.mrb[45].mxu0 }
 0x146   : > { %1731 = vst.msk [vmem:[#allocation2 + $0x20] sm:$0xff] %vm216_vm1, %v1715_v42  ;;  %v1976_v48 = vadd.f32 %v1960_v46, %v1881_v23  ;;  %v3387_v49 = vpop.f32.mrb[46].mxu1  ;;  %v1708_v22 = vld [vmem:[#allocation2 + $0x68] sm:$0xff] }
 0x147   : > { %1993 = vst.msk [vmem:[#allocation2 + $0x8] sm:$0xff] %vm216_vm1, %v1977_v45  ;;  %v1718_v51 = vadd.f32 %v3387_v49, %v1702_v50  ;;  %v1646_v52 = vpop.f32.mrb[47].mxu1  ;;  %v1707_v25 = vld [vmem:[#allocation2 + $0x60] sm:$0xff] }
 0x148   : > { %1992 = vst.msk [vmem:[#allocation2] sm:$0xff] %vm216_vm1, %v1976_v48  ;;  %v1717_v54 = vadd.f32 %v1701_v53, %v1646_v52  ;;  %v1963_v55 = vld [vmem:[#allocation2 + $0x18] sm:$0xff]  ;;  %v3413_v56 = vpop.f32.mrb[46].mxu0 }
 0x149   : > { %1734 = vst.msk [vmem:[#allocation2 + $0x38] sm:$0xff] %vm216_vm1, %v1718_v51  ;;  %v1979_v57 = vadd.f32 %v3407_v32, %v1963_v55  ;;  %v1962_v58 = vld [vmem:[#allocation2 + $0x10] sm:$0xff]  ;;  %v1911_v59 = vpop.f32.mrb[47].mxu0 }
 0x14a   : > { %1733 = vst.msk [vmem:[#allocation2 + $0x30] sm:$0xff] %vm216_vm1, %v1717_v54  ;;  %v1978_v60 = vadd.f32 %v1962_v58, %v1891_v35  ;;  %v3390_v61 = vpop.f32.mrb[48].mxu1  ;;  %v1710_v34 = vld [vmem:[#allocation2 + $0x78] sm:$0xff] }
 0x14b   : > { %1995 = vst.msk [vmem:[#allocation2 + $0x18] sm:$0xff] %vm216_vm1, %v1979_v57  ;;  %v1720_v63 = vadd.f32 %v3390_v61, %v1704_v62  ;;  %v1656_v0 = vpop.f32.mrb[49].mxu1  ;;  %v1709_v37 = vld [vmem:[#allocation2 + $0x70] sm:$0xff] }
 0x14c   : > { %1994 = vst.msk [vmem:[#allocation2 + $0x10] sm:$0xff] %vm216_vm1, %v1978_v60  ;;  %v1719_v2 = vadd.f32 %v1703_v1, %v1656_v0  ;;  %v1965_v3 = vld [vmem:[#allocation2 + $0x28] sm:$0xff]  ;;  %v3416_v4 = vpop.f32.mrb[48].mxu0 }
 0x14d   : > { %1736 = vst.msk [vmem:[#allocation2 + $0x48] sm:$0xff] %vm216_vm1, %v1720_v63  ;;  %v1981_v5 = vadd.f32 %v3410_v44, %v1965_v3  ;;  %v1964_v6 = vld [vmem:[#allocation2 + $0x20] sm:$0xff]  ;;  %v1921_v7 = vpop.f32.mrb[49].mxu0 }
 0x14e   : > { %1735 = vst.msk [vmem:[#allocation2 + $0x40] sm:$0xff] %vm216_vm1, %v1719_v2  ;;  %v1980_v8 = vadd.f32 %v1964_v6, %v1901_v47  ;;  %v3393_v9 = vpop.f32.mrb[50].mxu1  ;;  %v2223_v46 = vld [vmem:[#allocation2 + $0x8] sm:$0xff] }
 0x14f   : > { %1997 = vst.msk [vmem:[#allocation2 + $0x28] sm:$0xff] %vm216_vm1, %v1981_v5  ;;  %v1722_v11 = vadd.f32 %v3393_v9, %v1706_v10  ;;  %v1666_v12 = vpop.f32.mrb[51].mxu1  ;;  %v2222_v49 = vld [vmem:[#allocation2] sm:$0xff] }
 0x150   : > { %1996 = vst.msk [vmem:[#allocation2 + $0x20] sm:$0xff] %vm216_vm1, %v1980_v8  ;;  %v1721_v14 = vadd.f32 %v1705_v13, %v1666_v12  ;;  %v1967_v15 = vld [vmem:[#allocation2 + $0x38] sm:$0xff]  ;;  %v3419_v16 = vpop.f32.mrb[50].mxu0 }
 0x151   : > { %1738 = vst.msk [vmem:[#allocation2 + $0x58] sm:$0xff] %vm216_vm1, %v1722_v11  ;;  %v1983_v17 = vadd.f32 %v3413_v56, %v1967_v15  ;;  %v1966_v18 = vld [vmem:[#allocation2 + $0x30] sm:$0xff]  ;;  %v1931_v19 = vpop.f32.mrb[51].mxu0 }
 0x152   : > { %1737 = vst.msk [vmem:[#allocation2 + $0x50] sm:$0xff] %vm216_vm1, %v1721_v14  ;;  %v1982_v20 = vadd.f32 %v1966_v18, %v1911_v59  ;;  %v3396_v21 = vpop.f32.mrb[52].mxu1  ;;  %v2225_v58 = vld [vmem:[#allocation2 + $0x18] sm:$0xff] }
 0x153   : > { %1999 = vst.msk [vmem:[#allocation2 + $0x38] sm:$0xff] %vm216_vm1, %v1983_v17  ;;  %v1724_v23 = vadd.f32 %v3396_v21, %v1708_v22  ;;  %v1676_v24 = vpop.f32.mrb[53].mxu1  ;;  %v2224_v61 = vld [vmem:[#allocation2 + $0x10] sm:$0xff] }
 0x154   : > { %1998 = vst.msk [vmem:[#allocation2 + $0x30] sm:$0xff] %vm216_vm1, %v1982_v20  ;;  %v1723_v26 = vadd.f32 %v1707_v25, %v1676_v24  ;;  %v1969_v27 = vld [vmem:[#allocation2 + $0x48] sm:$0xff]  ;;  %v3422_v28 = vpop.f32.mrb[52].mxu0 }
 0x155   : > { %1740 = vst.msk [vmem:[#allocation2 + $0x68] sm:$0xff] %vm216_vm1, %v1724_v23  ;;  %v1985_v29 = vadd.f32 %v3416_v4, %v1969_v27  ;;  %v1968_v30 = vld [vmem:[#allocation2 + $0x40] sm:$0xff]  ;;  %v1941_v31 = vpop.f32.mrb[53].mxu0 }
 0x156   : > { %1739 = vst.msk [vmem:[#allocation2 + $0x60] sm:$0xff] %vm216_vm1, %v1723_v26  ;;  %v1984_v32 = vadd.f32 %v1968_v30, %v1921_v7  ;;  %v3399_v33 = vpop.f32.mrb[54].mxu1  ;;  %v2227_v6 = vld [vmem:[#allocation2 + $0x28] sm:$0xff] }
 0x157   : > { %2001 = vst.msk [vmem:[#allocation2 + $0x48] sm:$0xff] %vm216_vm1, %v1985_v29  ;;  %v1726_v35 = vadd.f32 %v3399_v33, %v1710_v34  ;;  %v1686_v36 = vpop.f32.mrb[55].mxu1  ;;  %v2226_v9 = vld [vmem:[#allocation2 + $0x20] sm:$0xff] }
 0x158   : > { %2000 = vst.msk [vmem:[#allocation2 + $0x40] sm:$0xff] %vm216_vm1, %v1984_v32  ;;  %v1725_v38 = vadd.f32 %v1709_v37, %v1686_v36  ;;  %v1971_v39 = vld [vmem:[#allocation2 + $0x58] sm:$0xff]  ;;  %v3425_v40 = vpop.f32.mrb[54].mxu0  ;;  %v4283_v34 = vld [vmem:[%s4455_s2] ss:$0 sm:$0xff] }
 0x159   : > { %1742 = vst.msk [vmem:[#allocation2 + $0x78] sm:$0xff] %vm216_vm1, %v1726_v35  ;;  %v1987_v41 = vadd.f32 %v3419_v16, %v1971_v39  ;;  %v1970_v42 = vld [vmem:[#allocation2 + $0x50] sm:$0xff]  ;;  %v1951_v43 = vpop.f32.mrb[55].mxu0 }
 0x15a   : > { %1741 = vst.msk [vmem:[#allocation2 + $0x70] sm:$0xff] %vm216_vm1, %v1725_v38  ;;  %v1986_v44 = vadd.f32 %v1970_v42, %v1931_v19  ;;  %v3430_v45 = vpop.f32.mrb[56].mxu1  ;;  %v2229_v18 = vld [vmem:[#allocation2 + $0x38] sm:$0xff] }
 0x15b   : > { %2003 = vst.msk [vmem:[#allocation2 + $0x58] sm:$0xff] %vm216_vm1, %v1987_v41  ;;  %v2239_v47 = vadd.f32 %v3430_v45, %v2223_v46  ;;  %v2143_v48 = vpop.f32.mrb[57].mxu1  ;;  %v2228_v21 = vld [vmem:[#allocation2 + $0x30] sm:$0xff] }
 0x15c   : > { %2002 = vst.msk [vmem:[#allocation2 + $0x50] sm:$0xff] %vm216_vm1, %v1986_v44  ;;  %v1973_v50 = vld [vmem:[#allocation2 + $0x68] sm:$0xff]  ;;  %v2238_v51 = vadd.f32 %v2222_v49, %v2143_v48  ;;  %v3456_v52 = vpop.f32.mrb[56].mxu0 }
 0x15d   : > { %2255 = vst.msk [vmem:[#allocation2 + $0x8] sm:$0xff] %vm216_vm1, %v2239_v47  ;;  %v1989_v53 = vadd.f32 %v3422_v28, %v1973_v50  ;;  %v1972_v54 = vld [vmem:[#allocation2 + $0x60] sm:$0xff]  ;;  %v2405_v55 = vpop.f32.mrb[57].mxu0 }
 0x15e   : > { %2254 = vst.msk [vmem:[#allocation2] sm:$0xff] %vm216_vm1, %v2238_v51  ;;  %v1988_v56 = vadd.f32 %v1972_v54, %v1941_v31  ;;  %v3433_v57 = vpop.f32.mrb[58].mxu1  ;;  %v2231_v30 = vld [vmem:[#allocation2 + $0x48] sm:$0xff] }
 0x15f   : > { %2005 = vst.msk [vmem:[#allocation2 + $0x68] sm:$0xff] %vm216_vm1, %v1989_v53  ;;  %v2241_v59 = vadd.f32 %v3433_v57, %v2225_v58  ;;  %v2153_v60 = vpop.f32.mrb[59].mxu1  ;;  %v2230_v33 = vld [vmem:[#allocation2 + $0x40] sm:$0xff] }
 0x160   : > { %2004 = vst.msk [vmem:[#allocation2 + $0x60] sm:$0xff] %vm216_vm1, %v1988_v56  ;;  %v1975_v62 = vld [vmem:[#allocation2 + $0x78] sm:$0xff]  ;;  %v2240_v63 = vadd.f32 %v2224_v61, %v2153_v60  ;;  %v3459_v0 = vpop.f32.mrb[58].mxu0 }
 0x161   : > { %2257 = vst.msk [vmem:[#allocation2 + $0x18] sm:$0xff] %vm216_vm1, %v2241_v59  ;;  %v1991_v1 = vadd.f32 %v3425_v40, %v1975_v62  ;;  %v1974_v2 = vld [vmem:[#allocation2 + $0x70] sm:$0xff]  ;;  %v2415_v3 = vpop.f32.mrb[59].mxu0 }
 0x162   : > { %2256 = vst.msk [vmem:[#allocation2 + $0x10] sm:$0xff] %vm216_vm1, %v2240_v63  ;;  %v1990_v4 = vadd.f32 %v1974_v2, %v1951_v43  ;;  %v3436_v5 = vpop.f32.mrb[60].mxu1  ;;  %v2233_v44 = vld [vmem:[#allocation2 + $0x58] sm:$0xff] }
 0x163   : > { %2007 = vst.msk [vmem:[#allocation2 + $0x78] sm:$0xff] %vm216_vm1, %v1991_v1  ;;  %v2243_v7 = vadd.f32 %v3436_v5, %v2227_v6  ;;  %v2163_v8 = vpop.f32.mrb[61].mxu1  ;;  %v2232_v49 = vld [vmem:[#allocation2 + $0x50] sm:$0xff] }
 0x164   : > { %2006 = vst.msk [vmem:[#allocation2 + $0x70] sm:$0xff] %vm216_vm1, %v1990_v4  ;;  %v2242_v10 = vadd.f32 %v2226_v9, %v2163_v8  ;;  %v2485_v11 = vld [vmem:[#allocation2 + $0x8] sm:$0xff]  ;;  %v3462_v12 = vpop.f32.mrb[60].mxu0 }
 0x165   : > { %2259 = vst.msk [vmem:[#allocation2 + $0x28] sm:$0xff] %vm216_vm1, %v2243_v7  ;;  %v2501_v13 = vadd.f32 %v3456_v52, %v2485_v11  ;;  %v2484_v14 = vld [vmem:[#allocation2] sm:$0xff]  ;;  %v2425_v15 = vpop.f32.mrb[61].mxu0 }
 0x166   : > { %2258 = vst.msk [vmem:[#allocation2 + $0x20] sm:$0xff] %vm216_vm1, %v2242_v10  ;;  %v2500_v16 = vadd.f32 %v2484_v14, %v2405_v55  ;;  %v3439_v17 = vpop.f32.mrb[62].mxu1  ;;  %v2235_v62 = vld [vmem:[#allocation2 + $0x68] sm:$0xff] }
 0x167   : > { %2517 = vst.msk [vmem:[#allocation2 + $0x8] sm:$0xff] %vm216_vm1, %v2501_v13  ;;  %v2245_v19 = vadd.f32 %v3439_v17, %v2229_v18  ;;  %v2173_v20 = vpop.f32.mrb[63].mxu1 }
 0x168   : > { %2516 = vst.msk [vmem:[#allocation2] sm:$0xff] %vm216_vm1, %v2500_v16  ;;  %v2244_v22 = vadd.f32 %v2228_v21, %v2173_v20  ;;  %v2487_v23 = vld [vmem:[#allocation2 + $0x18] sm:$0xff]  ;;  %v3465_v24 = vpop.f32.mrb[62].mxu0 }
 0x169   : > { %2261 = vst.msk [vmem:[#allocation2 + $0x38] sm:$0xff] %vm216_vm1, %v2245_v19  ;;  %v2503_v25 = vadd.f32 %v3459_v0, %v2487_v23  ;;  %v2486_v26 = vld [vmem:[#allocation2 + $0x10] sm:$0xff]  ;;  %v2435_v27 = vpop.f32.mrb[63].mxu0 }
 0x16a   : > { %2260 = vst.msk [vmem:[#allocation2 + $0x30] sm:$0xff] %vm216_vm1, %v2244_v22  ;;  %v2502_v28 = vadd.f32 %v2486_v26, %v2415_v3  ;;  %v3442_v29 = vpop.f32.mrb[64].mxu1  ;;  %v2234_v3 = vld [vmem:[#allocation2 + $0x60] sm:$0xff]  ;;  %v2237_v16 = vld [vmem:[#allocation2 + $0x78] sm:$0xff] }
 0x16b   : > { %2519 = vst.msk [vmem:[#allocation2 + $0x18] sm:$0xff] %vm216_vm1, %v2503_v25  ;;  %v2247_v31 = vadd.f32 %v3442_v29, %v2231_v30  ;;  %v2183_v32 = vpop.f32.mrb[65].mxu1  ;;  %v2236_v21 = vld [vmem:[#allocation2 + $0x70] sm:$0xff] }
 0x16c   : > { %2518 = vst.msk [vmem:[#allocation2 + $0x10] sm:$0xff] %vm216_vm1, %v2502_v28  ;;  %v2246_v35 = vadd.f32 %v2230_v33, %v2183_v32  ;;  %v2489_v36 = vld [vmem:[#allocation2 + $0x28] sm:$0xff]  ;;  %v3468_v37 = vpop.f32.mrb[64].mxu0 }
 0x16d   : > { %2263 = vst.msk [vmem:[#allocation2 + $0x48] sm:$0xff] %vm216_vm1, %v2247_v31  ;;  %v2505_v38 = vadd.f32 %v3462_v12, %v2489_v36  ;;  %v2488_v39 = vld [vmem:[#allocation2 + $0x20] sm:$0xff]  ;;  %v2445_v40 = vpop.f32.mrb[65].mxu0 }
 0x16e   : > { %v2533_v41 = vld [vmem:[#allocation2 + $0x8] sm:$0xff]  ;;  %2262 = vst.msk [vmem:[#allocation2 + $0x40] sm:$0xff] %vm216_vm1, %v2246_v35  ;;  %v2504_v42 = vadd.f32 %v2488_v39, %v2425_v15  ;;  %v3445_v43 = vpop.f32.mrb[66].mxu1 }
 0x16f   : > { %v4289_v45 = vadd.f32 %v4283_v34, %v2533_v41  ;;  %v2532_v46 = vld [vmem:[#allocation2] sm:$0xff]  ;;  %2521 = vst.msk [vmem:[#allocation2 + $0x28] sm:$0xff] %vm216_vm1, %v2505_v38  ;;  %v2249_v47 = vadd.f32 %v3445_v43, %v2233_v44  ;;  %v2193_v48 = vpop.f32.mrb[67].mxu1 }
 0x170   : > { %v4293_v50 = vadd.f32 %v4283_v34, %v2532_v46  ;;  %2520 = vst.msk [vmem:[#allocation2 + $0x20] sm:$0xff] %vm216_vm1, %v2504_v42  ;;  %v2248_v51 = vadd.f32 %v2232_v49, %v2193_v48  ;;  %v2491_v52 = vld [vmem:[#allocation2 + $0x38] sm:$0xff]  ;;  %v3471_v53 = vpop.f32.mrb[66].mxu0 }
 0x171   : > { %v3074_v54 = vmul.f32 -1.442695, %v4289_v45  ;;  %2265 = vst.msk [vmem:[#allocation2 + $0x58] sm:$0xff] %vm216_vm1, %v2249_v47  ;;  %v2507_v55 = vadd.f32 %v3465_v24, %v2491_v52  ;;  %v2490_v56 = vld [vmem:[#allocation2 + $0x30] sm:$0xff]  ;;  %v2455_v57 = vpop.f32.mrb[67].mxu0 }
 0x172   : > { %v3073_v58 = vmul.f32 -1.442695, %v4293_v50  ;;  %v2535_v59 = vld [vmem:[#allocation2 + $0x18] sm:$0xff]  ;;  %2264 = vst.msk [vmem:[#allocation2 + $0x50] sm:$0xff] %vm216_vm1, %v2248_v51  ;;  %v2506_v60 = vadd.f32 %v2490_v56, %v2435_v27  ;;  %v3448_v61 = vpop.f32.mrb[68].mxu1 }
 0x173   : > { %3521 = vpow2.f32 %v3074_v54  ;;  %v4301_v63 = vadd.f32 %v4283_v34, %v2535_v59  ;;  %v2534_v0 = vld [vmem:[#allocation2 + $0x10] sm:$0xff]  ;;  %2523 = vst.msk [vmem:[#allocation2 + $0x38] sm:$0xff] %vm216_vm1, %v2507_v55  ;;  %v2251_v1 = vadd.f32 %v3448_v61, %v2235_v62  ;;  %v2203_v2 = vpop.f32.mrb[69].mxu1 }
 0x174   : > { %3523 = vpow2.f32 %v3073_v58  ;;  %v4305_v4 = vadd.f32 %v4283_v34, %v2534_v0  ;;  %2522 = vst.msk [vmem:[#allocation2 + $0x30] sm:$0xff] %vm216_vm1, %v2506_v60  ;;  %v2250_v5 = vadd.f32 %v2234_v3, %v2203_v2  ;;  %v2493_v6 = vld [vmem:[#allocation2 + $0x48] sm:$0xff]  ;;  %v3474_v7 = vpop.f32.mrb[68].mxu0 }
 0x175   : > { %v3076_v8 = vmul.f32 -1.442695, %v4301_v63  ;;  %2267 = vst.msk [vmem:[#allocation2 + $0x68] sm:$0xff] %vm216_vm1, %v2251_v1  ;;  %v2509_v9 = vadd.f32 %v3468_v37, %v2493_v6  ;;  %v2492_v10 = vld [vmem:[#allocation2 + $0x40] sm:$0xff]  ;;  %v2465_v11 = vpop.f32.mrb[69].mxu0 }
 0x176   : > { %v3075_v12 = vmul.f32 -1.442695, %v4305_v4  ;;  %v2537_v13 = vld [vmem:[#allocation2 + $0x28] sm:$0xff]  ;;  %2266 = vst.msk [vmem:[#allocation2 + $0x60] sm:$0xff] %vm216_vm1, %v2250_v5  ;;  %v2508_v14 = vadd.f32 %v2492_v10, %v2445_v40  ;;  %v3451_v15 = vpop.f32.mrb[70].mxu1 }
 0x177   : > { %3525 = vpow2.f32 %v3076_v8  ;;  %v4314_v17 = vadd.f32 %v4283_v34, %v2537_v13  ;;  %v2536_v18 = vld [vmem:[#allocation2 + $0x20] sm:$0xff]  ;;  %2525 = vst.msk [vmem:[#allocation2 + $0x48] sm:$0xff] %vm216_vm1, %v2509_v9  ;;  %v2253_v19 = vadd.f32 %v3451_v15, %v2237_v16  ;;  %v2213_v20 = vpop.f32.mrb[71].mxu1 }
 0x178   : > { %3527 = vpow2.f32 %v3075_v12  ;;  %v4318_v22 = vadd.f32 %v4283_v34, %v2536_v18  ;;  %2524 = vst.msk [vmem:[#allocation2 + $0x40] sm:$0xff] %vm216_vm1, %v2508_v14  ;;  %v2252_v23 = vadd.f32 %v2236_v21, %v2213_v20  ;;  %v2495_v24 = vld [vmem:[#allocation2 + $0x58] sm:$0xff]  ;;  %v3477_v25 = vpop.f32.mrb[70].mxu0 }
 0x179   : > { %v3078_v26 = vmul.f32 -1.442695, %v4314_v17  ;;  %2269 = vst.msk [vmem:[#allocation2 + $0x78] sm:$0xff] %vm216_vm1, %v2253_v19  ;;  %v2511_v27 = vadd.f32 %v3471_v53, %v2495_v24  ;;  %v2494_v28 = vld [vmem:[#allocation2 + $0x50] sm:$0xff]  ;;  %v2475_v29 = vpop.f32.mrb[71].mxu0 }
 0x17a   : > { %v3077_v30 = vmul.f32 -1.442695, %v4318_v22  ;;  %v2539_v31 = vld [vmem:[#allocation2 + $0x38] sm:$0xff]  ;;  %2268 = vst.msk [vmem:[#allocation2 + $0x70] sm:$0xff] %vm216_vm1, %v2252_v23  ;;  %v2510_v32 = vadd.f32 %v2494_v28, %v2455_v57 }
 0x17b   : > { %3529 = vpow2.f32 %v3078_v26  ;;  %v4332_v33 = vadd.f32 %v4283_v34, %v2539_v31  ;;  %v2538_v35 = vld [vmem:[#allocation2 + $0x30] sm:$0xff]  ;;  %2527 = vst.msk [vmem:[#allocation2 + $0x58] sm:$0xff] %vm216_vm1, %v2511_v27 }
 0x17c   : > { %3531 = vpow2.f32 %v3077_v30  ;;  %v4336_v36 = vadd.f32 %v4283_v34, %v2538_v35  ;;  %2526 = vst.msk [vmem:[#allocation2 + $0x50] sm:$0xff] %vm216_vm1, %v2510_v32  ;;  %v2497_v37 = vld [vmem:[#allocation2 + $0x68] sm:$0xff] }
 0x17d   : > { %v3522_v38 = vpop.eup %3521  ;;  %v3080_v39 = vmul.f32 -1.442695, %v4332_v33  ;;  %v2513_v40 = vadd.f32 %v3474_v7, %v2497_v37  ;;  %v2496_v41 = vld [vmem:[#allocation2 + $0x60] sm:$0xff] }
 0x17e   : > { %v3524_v42 = vpop.eup %3523  ;;  %v2620_v43 = vadd.f32 1.0, %v3522_v38  ;;  %v3079_v44 = vmul.f32 -1.442695, %v4336_v36  ;;  %v2541_v46 = vld [vmem:[#allocation2 + $0x48] sm:$0xff]  ;;  %v2512_v47 = vadd.f32 %v2496_v41, %v2465_v11 }
 0x17f   : > { %v2619_v48 = vadd.f32 1.0, %v3524_v42  ;;  %3533 = vpow2.f32 %v3080_v39  ;;  %v4348_v49 = vadd.f32 %v4283_v34, %v2541_v46  ;;  %v2540_v51 = vld [vmem:[#allocation2 + $0x40] sm:$0xff]  ;;  %2529 = vst.msk [vmem:[#allocation2 + $0x68] sm:$0xff] %vm216_vm1, %v2513_v40 }
 0x180   : > { %3535 = vrcp.f32 %v2620_v43  ;;  %v4352_v52 = vadd.f32 %v4283_v34, %v2540_v51  ;;  %2528 = vst.msk [vmem:[#allocation2 + $0x60] sm:$0xff] %vm216_vm1, %v2512_v47  ;;  %v2499_v53 = vld [vmem:[#allocation2 + $0x78] sm:$0xff] }
 0x181   : > { %v3526_v54 = vpop.eup %3525  ;;  %3537 = vrcp.f32 %v2619_v48  ;;  %v3082_v55 = vmul.f32 -1.442695, %v4348_v49  ;;  %v2515_v56 = vadd.f32 %v3477_v25, %v2499_v53  ;;  %v2498_v57 = vld [vmem:[#allocation2 + $0x70] sm:$0xff] }
 0x182   : > { %v3528_v58 = vpop.eup %3527  ;;  %v2622_v59 = vadd.f32 1.0, %v3526_v54  ;;  %3539 = vpow2.f32 %v3079_v44  ;;  %v3081_v60 = vmul.f32 -1.442695, %v4352_v52  ;;  %v2543_v61 = vld [vmem:[#allocation2 + $0x58] sm:$0xff]  ;;  %v2514_v62 = vadd.f32 %v2498_v57, %v2475_v29 }
 0x183   : > { %v2621_v0 = vadd.f32 1.0, %v3528_v58  ;;  %3541 = vpow2.f32 %v3082_v55  ;;  %v4360_v1 = vadd.f32 %v4283_v34, %v2543_v61  ;;  %v2542_v2 = vld [vmem:[#allocation2 + $0x50] sm:$0xff]  ;;  %2531 = vst.msk [vmem:[#allocation2 + $0x78] sm:$0xff] %vm216_vm1, %v2515_v56 }
 0x184   : > { %3543 = vrcp.f32 %v2622_v59  ;;  %v4364_v3 = vadd.f32 %v4283_v34, %v2542_v2  ;;  %2530 = vst.msk [vmem:[#allocation2 + $0x70] sm:$0xff] %vm216_vm1, %v2514_v62 }
 0x185   : > { %v3530_v5 = vpop.eup %3529  ;;  %3545 = vrcp.f32 %v2621_v0  ;;  %v3084_v6 = vmul.f32 -1.442695, %v4360_v1 }
 0x186   : > { %v3532_v7 = vpop.eup %3531  ;;  %v2624_v8 = vadd.f32 1.0, %v3530_v5  ;;  %3547 = vpow2.f32 %v3081_v60  ;;  %v3083_v9 = vmul.f32 -1.442695, %v4364_v3  ;;  %v2545_v10 = vld [vmem:[#allocation2 + $0x68] sm:$0xff] }
 0x187   : > { %v2623_v11 = vadd.f32 1.0, %v3532_v7  ;;  %3549 = vpow2.f32 %v3084_v6  ;;  %v4370_v12 = vadd.f32 %v4283_v34, %v2545_v10  ;;  %v2544_v13 = vld [vmem:[#allocation2 + $0x60] sm:$0xff] }
 0x188   : > { %3551 = vrcp.f32 %v2624_v8  ;;  %v4373_v14 = vadd.f32 %v4283_v34, %v2544_v13 }
 0x189   : > { %v3534_v15 = vpop.eup %3533  ;;  %3553 = vrcp.f32 %v2623_v11  ;;  %v3086_v16 = vmul.f32 -1.442695, %v4370_v12 }
 0x18a   : > { %v3536_v18 = vpop.eup %3535  ;;  %v2626_v19 = vadd.f32 1.0, %v3534_v15  ;;  %3555 = vpow2.f32 %v3083_v9  ;;  %v3085_v20 = vmul.f32 -1.442695, %v4373_v14  ;;  %v2547_v21 = vld [vmem:[#allocation2 + $0x78] sm:$0xff] }
 0x18b   : > { %v3538_v23 = vpop.eup %3537  ;;  %v2668_v24 = vmul.f32 %v3536_v18, %v4289_v45  ;;  %3557 = vpow2.f32 %v3086_v16  ;;  %v4384_v25 = vadd.f32 %v4283_v34, %v2547_v21  ;;  %v2546_v26 = vld [vmem:[#allocation2 + $0x70] sm:$0xff] }
 0x18c   : > { %v3540_v27 = vpop.eup %3539  ;;  %v2667_v28 = vmul.f32 %v3538_v23, %v4293_v50  ;;  %3559 = vrcp.f32 %v2626_v19  ;;  %v4388_v29 = vadd.f32 %v4283_v34, %v2546_v26 }
 0x18d   : > { %v3542_v30 = vpop.eup %3541  ;;  %2684 = vst.msk [vmem:[%s4379_s4 + $0x8] sm:$0xff] %vm216_vm1, %v2668_v24  ;;  %v2625_v31 = vadd.f32 1.0, %v3540_v27  ;;  %3561 = vpow2.f32 %v3085_v20  ;;  %v3088_v45 = vmul.f32 -1.442695, %v4384_v25 }
 0x18e   : > { %v3544_v32 = vpop.eup %3543  ;;  %2683 = vst.msk [vmem:[%s4379_s4] sm:$0xff] %vm216_vm1, %v2667_v28  ;;  %v2628_v35 = vadd.f32 1.0, %v3542_v30  ;;  %v3087_v37 = vmul.f32 -1.442695, %v4388_v29 }
 0x18f   : > { %v3546_v50 = vpop.eup %3545  ;;  %v2670_v38 = vmul.f32 %v3544_v32, %v4301_v63  ;;  %3563 = vrcp.f32 %v2625_v31 }
 0x190   : > { %v3548_v34 = vpop.eup %3547  ;;  %v2669_v39 = vmul.f32 %v3546_v50, %v4305_v4  ;;  %3565 = vrcp.f32 %v2628_v35 }
 0x191   : > { %v3550_v40 = vpop.eup %3549  ;;  %2686 = vst.msk [vmem:[%s4379_s4 + $0x18] sm:$0xff] %vm216_vm1, %v2670_v38  ;;  %v2627_v41 = vadd.f32 1.0, %v3548_v34  ;;  %3567 = vpow2.f32 %v3088_v45 }
 0x192   : > { %v3552_v42 = vpop.eup %3551  ;;  %2685 = vst.msk [vmem:[%s4379_s4 + $0x10] sm:$0xff] %vm216_vm1, %v2669_v39  ;;  %v2630_v43 = vadd.f32 1.0, %v3550_v40  ;;  %3569 = vpow2.f32 %v3087_v37 }
 0x193   : > { %v3554_v44 = vpop.eup %3553  ;;  %v2672_v63 = vmul.f32 %v3552_v42, %v4314_v17  ;;  %3571 = vrcp.f32 %v2627_v41 }
 0x194   : > { %v3556_v46 = vpop.eup %3555  ;;  %v2671_v4 = vmul.f32 %v3554_v44, %v4318_v22  ;;  %3573 = vrcp.f32 %v2630_v43 }
 0x195   : > { %v3558_v47 = vpop.eup %3557  ;;  %2688 = vst.msk [vmem:[%s4379_s4 + $0x28] sm:$0xff] %vm216_vm1, %v2672_v63  ;;  %v2629_v48 = vadd.f32 1.0, %v3556_v46 }
 0x196   : > { %v3560_v51 = vpop.eup %3559  ;;  %2687 = vst.msk [vmem:[%s4379_s4 + $0x20] sm:$0xff] %vm216_vm1, %v2671_v4  ;;  %v2632_v53 = vadd.f32 1.0, %v3558_v47 }
 0x197   : > { %v3562_v54 = vpop.eup %3561  ;;  %v2674_v55 = vmul.f32 %v3560_v51, %v4332_v33  ;;  %3575 = vrcp.f32 %v2629_v48 }
 0x198   : > { %3577 = vrcp.f32 %v2632_v53  ;;  %v2631_v17 = vadd.f32 1.0, %v3562_v54 }
 0x199   : > { %v3564_v56 = vpop.eup %3563  ;;  %2690 = vst.msk [vmem:[%s4379_s4 + $0x38] sm:$0xff] %vm216_vm1, %v2674_v55 }
 0x19a   : > { %v3566_v22 = vpop.eup %3565  ;;  %v2673_v57 = vmul.f32 %v3564_v56, %v4336_v36  ;;  %3579 = vrcp.f32 %v2631_v17 }
 0x19b   : > { %v3568_v58 = vpop.eup %3567  ;;  %v2676_v59 = vmul.f32 %v3566_v22, %v4348_v49 }
 0x19c   : > { %v3570_v60 = vpop.eup %3569  ;;  %2689 = vst.msk [vmem:[%s4379_s4 + $0x30] sm:$0xff] %vm216_vm1, %v2673_v57  ;;  %v2634_v61 = vadd.f32 1.0, %v3568_v58 }
 0x19d   : > { %v3572_v33 = vpop.eup %3571  ;;  %2692 = vst.msk [vmem:[%s4379_s4 + $0x48] sm:$0xff] %vm216_vm1, %v2676_v59  ;;  %v2633_v62 = vadd.f32 1.0, %v3570_v60 }
 0x19e   : > { %v3574_v0 = vpop.eup %3573  ;;  %v2675_v2 = vmul.f32 %v3572_v33, %v4352_v52  ;;  %3581 = vrcp.f32 %v2634_v61 }
 0x19f   : > { %v2678_v36 = vmul.f32 %v3574_v0, %v4360_v1  ;;  %3583 = vrcp.f32 %v2633_v62 }
 0x1a0   : > { %2691 = vst.msk [vmem:[%s4379_s4 + $0x40] sm:$0xff] %vm216_vm1, %v2675_v2 }
 0x1a1   : > { %v3576_v49 = vpop.eup %3575  ;;  %2694 = vst.msk [vmem:[%s4379_s4 + $0x58] sm:$0xff] %vm216_vm1, %v2678_v36 }
 0x1a2   : > { %v3578_v5 = vpop.eup %3577  ;;  %v2677_v6 = vmul.f32 %v3576_v49, %v4364_v3 }
 0x1a3   : > { %v2680_v7 = vmul.f32 %v3578_v5, %v4370_v12 }
 0x1a4   : > { %v3580_v8 = vpop.eup %3579  ;;  %2693 = vst.msk [vmem:[%s4379_s4 + $0x50] sm:$0xff] %vm216_vm1, %v2677_v6 }
 0x1a5   : > { %2696 = vst.msk [vmem:[%s4379_s4 + $0x68] sm:$0xff] %vm216_vm1, %v2680_v7  ;;  %v2679_v52 = vmul.f32 %v3580_v8, %v4373_v14 }
 0x1a7   : > { %2695 = vst.msk [vmem:[%s4379_s4 + $0x60] sm:$0xff] %vm216_vm1, %v2679_v52 }
 0x1a8   : > { %v3582_v1 = vpop.eup %3581 }
 0x1a9   : > { %v3584_v9 = vpop.eup %3583  ;;  %v2682_v10 = vmul.f32 %v3582_v1, %v4384_v25 }
 0x1aa   : > { %v2681_v11 = vmul.f32 %v3584_v9, %v4388_v29 }
 0x1ab   : > { %2698 = vst.msk [vmem:[%s4379_s4 + $0x78] sm:$0xff] %vm216_vm1, %v2682_v10 }
 0x1ac   : > { %2697 = vst.msk [vmem:[%s4379_s4 + $0x70] sm:$0xff] %vm216_vm1, %v2681_v11 }
 0x1ad PF: > { %s13_s16 = sadd.s32 1, %s3623_s16   ;;  %s4458_s12 = smov %s3615_s14 }
 0x1ae   : > { %p10_p7 = scmp.ge.s32.totalorder %s13_s16, 6   ;;  %s4459_s13 = smov %s3619_s15 }
 0x1af   : > { %s4460_s14 = smov %s4463_s17  ;;  %s4461_s15 = smov %s4467_s18 }
 0x1b0   :  { %12 = sbr.rel (!%p10_p7) target bundleno = 3 (0x3), region = 73 }

</bundles_post_ra>
